<compile_context>
chip_gen: v7x
topology: tpu7x:2x2x1
jax: 0.10.0
libtpu: 0.0.40
codegen_flags: <defaults>
</compile_context>

<pallas_src>
import jax
import jax.numpy as jnp
import numpy as np
from jax import lax
from jax.experimental import pallas as pl
from jax.experimental.pallas import tpu as pltpu

E_LOSS_WEIGHT = 60.0         # 2D keypoint loss weight
E_3D_LOSS_WEIGHT = 30.0      # 3D keypoint loss weight
E_POSE_LOSS_WEIGHT = 1.0     # SMPL pose loss weight
E_SHAPE_LOSS_WEIGHT = 0.001  # SMPL shape loss weight

# Row layout of the packed "small" operand (features on sublanes, frames on lanes)
_ROW_CONF = 0        # rows  0..48 : per-joint 2D confidence
_ROW_PSHAPE = 49     # rows 49..58 : predicted betas
_ROW_GSHAPE = 59     # rows 59..68 : ground-truth betas
_ROW_W3D = 69        # row  69     : w_3d mask
_ROW_WSMPL = 70      # row  70     : w_smpl mask
_SMALL_ROWS = 71


# ----------------------------------------------------------------------------
# In-kernel unit-quaternion from axis-angle (component-wise, frames on lanes)
# ----------------------------------------------------------------------------
def _unit_quat_comps(ax, ay, az):
    """batch_rodrigues' quaternion, component-wise.

    ax/ay/az: (J, B) axis-angle components (joints on sublanes, frames on lanes).
    Returns the 4 unit-quaternion components, each (J, B). Pure VPU/EUP ops,
    no cross-lane shuffles; rsqrt-multiply instead of sqrt+divide.
    """
    ex, ey, ez = ax + 1e-8, ay + 1e-8, az + 1e-8
    sumsq = ex * ex + ey * ey + ez * ez
    angle = jnp.sqrt(sumsq)
    inv = lax.rsqrt(sumsq)
    nx, ny, nz = ax * inv, ay * inv, az * inv
    half = angle * 0.5
    vc = jnp.cos(half)
    vs = jnp.sin(half)
    qw, qx, qy, qz = vc, vs * nx, vs * ny, vs * nz
    qinv = lax.rsqrt(qw * qw + qx * qx + qy * qy + qz * qz)
    return qw * qinv, qx * qinv, qy * qinv, qz * qinv


# ----------------------------------------------------------------------------
# Pallas kernel: per-block partial sums of every loss term
# ----------------------------------------------------------------------------
def _vibe_loss_kernel(p2d_ref, g2d_ref, p3c_ref, g3c_ref,
                      ppose_ref, gpose_ref, small_ref, out_ref):
    # ---- 2D keypoint loss: conf-weighted squared error (de-interleaved x/y) --
    dx = p2d_ref[0] - g2d_ref[0]                                # (49, BN)
    dy = p2d_ref[1] - g2d_ref[1]                                # (49, BN)
    conf = small_ref[_ROW_CONF:_ROW_PSHAPE, :]                  # (49, BN)
    out_ref[0, 0] = jnp.sum(conf * (dx * dx + dy * dy))

    # ---- 3D keypoint loss (joints 25:39, pelvis-centered in wrapper) --------
    w3 = small_ref[_ROW_W3D:_ROW_W3D + 1, :]                    # (1, BN)
    d3 = p3c_ref[...] - g3c_ref[...]                            # (42, BN)
    out_ref[0, 1] = jnp.sum(w3 * jnp.sum(d3 * d3, axis=0, keepdims=True))

    # ---- SMPL pose loss via quaternion identity ------------------------------
    # ||R_p - R_g||_F^2 = 8 * (1 - (q_p . q_g)^2) for unit quaternions.
    ws = small_ref[_ROW_WSMPL:_ROW_WSMPL + 1, :]                # (1, BN)
    pw, px, py, pz = _unit_quat_comps(ppose_ref[0], ppose_ref[1], ppose_ref[2])
    gw, gx, gy, gz = _unit_quat_comps(gpose_ref[0], gpose_ref[1], gpose_ref[2])
    qdot = pw * gw + px * gx + py * gy + pz * gz                # (24, BN)
    sse_pose = 8.0 * (24.0 - jnp.sum(qdot * qdot, axis=0, keepdims=True))
    out_ref[0, 2] = jnp.sum(ws * sse_pose)

    # ---- SMPL shape loss: betas, masked by w_smpl ----------------------------
    dsh = (small_ref[_ROW_PSHAPE:_ROW_GSHAPE, :] -
           small_ref[_ROW_GSHAPE:_ROW_W3D, :])                  # (10, BN)
    out_ref[0, 3] = jnp.sum(ws * jnp.sum(dsh * dsh, axis=0, keepdims=True))


def _loss_partial_sums(p2d, g2d, p3c, g3c, ppose, gpose, small, *, block_n):
    n_pad = p3c.shape[-1]
    num_blocks = n_pad // block_n

    in_specs = [
        pl.BlockSpec((2, 49, block_n), lambda i: (0, 0, i)),    # p2d
        pl.BlockSpec((2, 49, block_n), lambda i: (0, 0, i)),    # g2d
        pl.BlockSpec((42, block_n), lambda i: (0, i)),          # p3c
        pl.BlockSpec((42, block_n), lambda i: (0, i)),          # g3c
        pl.BlockSpec((3, 24, block_n), lambda i: (0, 0, i)),    # ppose
        pl.BlockSpec((3, 24, block_n), lambda i: (0, 0, i)),    # gpose
        pl.BlockSpec((_SMALL_ROWS, block_n), lambda i: (0, i)), # packed small
    ]

    in_bytes = 4 * n_pad * (2 * 2 * 49 + 2 * 42 + 2 * 3 * 24 + _SMALL_ROWS)
    cost = pl.CostEstimate(
        flops=int(n_pad * (49 * 6 + 42 * 4 + 24 * 70 + 10 * 4)),
        transcendentals=int(n_pad * 24 * 2 * 5),
        bytes_accessed=int(in_bytes + num_blocks * 16))

    return pl.pallas_call(
        _vibe_loss_kernel,
        out_shape=jax.ShapeDtypeStruct((num_blocks, 4), jnp.float32),
        grid=(num_blocks,),
        in_specs=in_specs,
        out_specs=pl.BlockSpec((1, 4), lambda i: (i, 0),
                               memory_space=pltpu.MemorySpace.SMEM),
        compiler_params=pltpu.CompilerParams(dimension_semantics=("parallel",)),
        cost_estimate=cost,
    )(p2d, g2d, p3c, g3c, ppose, gpose, small)


def _pad_lanes(a, n_pad):
    pad = n_pad - a.shape[-1]
    if pad <= 0:
        return a
    cfg = [(0, 0)] * (a.ndim - 1) + [(0, pad)]
    return jnp.pad(a, cfg)


def _pick_block(n_max):
    """Frame-block size: full extent when tiny, else <=2048 with >=2 blocks."""
    if n_max <= 256:
        return n_max
    half = -(-n_max // 2)                      # ceil(n/2) -> at least 2 blocks
    return min(2048, -(-half // 128) * 128)    # round up to a multiple of 128


# ----------------------------------------------------------------------------
# Wrapper: re-layout (lane-dense, frames on lanes), pad, call kernel, finalize
# ----------------------------------------------------------------------------
def vibe_loss(generator_outputs, data_2d, data_3d):
    """JAX/Pallas equivalent of VIBELoss.forward -> (gen_loss, loss_dict)."""
    reduce_ = lambda x: x.reshape((x.shape[0] * x.shape[1],) + x.shape[2:])

    if data_2d:
        sample_2d_count = data_2d['kp_2d'].shape[0]
        real_2d = jnp.concatenate((data_2d['kp_2d'], data_3d['kp_2d']), axis=0)
    else:
        sample_2d_count = 0
        real_2d = data_3d['kp_2d']

    real_2d = reduce_(real_2d).astype(jnp.float32)                 # (N2, 49, 3)
    real_3d = reduce_(data_3d['kp_3d']).astype(jnp.float32)        # (N3, 49, 3)
    data_3d_theta = reduce_(data_3d['theta']).astype(jnp.float32)  # (N3, 85)
    # Contract: equivalence with PyTorch's boolean row selection requires
    # strictly {0,1} masks; fractional values become weights, not selections.
    w_3d = data_3d['w_3d'].reshape(-1).astype(jnp.float32)         # (N3,)
    w_smpl = data_3d['w_smpl'].reshape(-1).astype(jnp.float32)     # (N3,)

    preds = generator_outputs[-1]
    pred_j3d = reduce_(preds['kp_3d'][sample_2d_count:]).astype(jnp.float32)
    pred_theta = reduce_(preds['theta'][sample_2d_count:]).astype(jnp.float32)
    pred_j2d = reduce_(preds['kp_2d']).astype(jnp.float32)         # (N2, 49, 2)

    n2, k2 = pred_j2d.shape[0], pred_j2d.shape[1]
    n3 = pred_theta.shape[0]

    # ---- lane-dense re-layout: frame axis on lanes (last dim) --------------
    p2d = jnp.transpose(pred_j2d, (2, 1, 0))                       # (2, 49, N2)
    g2d = jnp.transpose(real_2d[:, :, :2], (2, 1, 0))              # (2, 49, N2)
    conf = real_2d[:, :, 2].T                                      # (49, N2)

    kp_p = pred_j3d[:, 25:39, :]
    kp_g = real_3d[:, 25:39, :]
    pel_p = 0.5 * (pred_j3d[:, 27, :] + pred_j3d[:, 28, :])
    pel_g = 0.5 * (real_3d[:, 27, :] + real_3d[:, 28, :])
    p3c = (kp_p - pel_p[:, None, :]).reshape(n3, 42).T             # (42, N3)
    g3c = (kp_g - pel_g[:, None, :]).reshape(n3, 42).T             # (42, N3)

    ppose = jnp.transpose(pred_theta[:, 3:75].reshape(n3, 24, 3), (2, 1, 0))      # (3,24,N3)
    gpose = jnp.transpose(data_3d_theta[:, 3:75].reshape(n3, 24, 3), (2, 1, 0))   # (3,24,N3)

    # Packed small-operand buffer over N3 frames (betas + masks); conf (over N2
    # frames) is prepended after padding so the kernel sees one (71, N) stream.
    small3 = jnp.concatenate([pred_theta[:, 75:].T,                # (10, N3)
                              data_3d_theta[:, 75:].T,             # (10, N3)
                              w_3d[None, :], w_smpl[None, :]], axis=0)   # (22, N3)

    # ---- pad frame axes to a common lane extent, pick block size -----------
    n_max = max(n2, n3)
    block_n = _pick_block(n_max)
    n_pad = -(-n_max // block_n) * block_n      # padded frames carry zero mask/conf

    small = jnp.concatenate([_pad_lanes(conf, n_pad),
                             _pad_lanes(small3, n_pad)], axis=0)   # (71, n_pad)
    args = [_pad_lanes(a, n_pad) for a in (p2d, g2d, p3c, g3c, ppose, gpose)]

    partials = _loss_partial_sums(*args, small, block_n=block_n)   # (G, 4)
    sums = jnp.sum(partials, axis=0)

    # Mask counts computed in the wrapper (cheap; removes 2 kernel reductions).
    cnt3d = jnp.sum(w_3d)
    cnts = jnp.sum(w_smpl)

    loss_kp_2d = sums[0] / (n2 * k2 * 2) * E_LOSS_WEIGHT
    loss_kp_3d = jnp.where(
        cnt3d > 0, sums[1] / jnp.maximum(cnt3d, 1.0) / (14 * 3), 0.0) * E_3D_LOSS_WEIGHT
    # TODO(synk): when w_smpl selects zero rows, PyTorch omits the pose/shape
    # entries from loss_dict (and would NaN); here they are reported as 0.
    loss_pose = jnp.where(
        cnts > 0, sums[2] / jnp.maximum(cnts, 1.0) / (24 * 9), 0.0) * E_POSE_LOSS_WEIGHT
    loss_shape = jnp.where(
        cnts > 0, sums[3] / jnp.maximum(cnts, 1.0) / 10.0, 0.0) * E_SHAPE_LOSS_WEIGHT

    loss_dict = {'loss_kp_2d': loss_kp_2d, 'loss_kp_3d': loss_kp_3d,
                 'loss_shape': loss_shape, 'loss_pose': loss_pose}
    gen_loss = loss_kp_2d + loss_kp_3d + loss_shape + loss_pose
    return gen_loss, loss_dict


# ----------------------------------------------------------------------------
# Pure-JAX eager reference (direct PyTorch port with boolean masking)
# ----------------------------------------------------------------------------
def _rodrigues9_ref(aa):
    norm = jnp.sqrt(jnp.sum((aa + 1e-8) ** 2, axis=1, keepdims=True))
    normalized = aa / norm
    half = norm * 0.5
    v_cos = jnp.cos(half)
    v_sin = jnp.sin(half)
    quat = jnp.concatenate([v_cos, v_sin * normalized], axis=1)
    qn = quat / jnp.sqrt(jnp.sum(quat * quat, axis=1, keepdims=True))
    w, x, y, z = qn[:, 0:1], qn[:, 1:2], qn[:, 2:3], qn[:, 3:4]
    w2, x2, y2, z2 = w * w, x * x, y * y, z * z
    wx, wy, wz = w * x, w * y, w * z
    xy, xz, yz = x * y, x * z, y * z
    return jnp.concatenate([
        w2 + x2 - y2 - z2, 2 * xy - 2 * wz, 2 * wy + 2 * xz,
        2 * wz + 2 * xy, w2 - x2 + y2 - z2, 2 * yz - 2 * wx,
        2 * xz - 2 * wy, 2 * wx + 2 * yz, w2 - x2 - y2 + z2], axis=1)


def vibe_loss_reference(generator_outputs, data_2d, data_3d):
    reduce_ = lambda x: x.reshape((x.shape[0] * x.shape[1],) + x.shape[2:])
    if data_2d:
        sample_2d_count = data_2d['kp_2d'].shape[0]
        real_2d = jnp.concatenate((data_2d['kp_2d'], data_3d['kp_2d']), 0)
    else:
        sample_2d_count = 0
        real_2d = data_3d['kp_2d']
    real_2d = reduce_(real_2d)
    real_3d = reduce_(data_3d['kp_3d'])
    data_3d_theta = reduce_(data_3d['theta'])
    w_3d = data_3d['w_3d'].reshape(-1).astype(bool)
    w_smpl = data_3d['w_smpl'].reshape(-1).astype(bool)
    preds = generator_outputs[-1]
    pred_j3d = reduce_(preds['kp_3d'][sample_2d_count:])[w_3d]
    pred_theta = reduce_(preds['theta'][sample_2d_count:])[w_smpl]
    pred_j2d = reduce_(preds['kp_2d'])
    data_3d_theta = data_3d_theta[w_smpl]
    real_3d = real_3d[w_3d]

    conf = real_2d[:, :, -1:]
    loss_kp_2d = jnp.mean(conf * (pred_j2d - real_2d[:, :, :-1]) ** 2) * E_LOSS_WEIGHT

    pk = pred_j3d[:, 25:39, :]
    gk = real_3d[:, 25:39, :]
    gp = (gk[:, 2, :] + gk[:, 3, :]) / 2
    pp = (pk[:, 2, :] + pk[:, 3, :]) / 2
    loss_kp_3d = jnp.mean(((pk - pp[:, None, :]) - (gk - gp[:, None, :])) ** 2) * E_3D_LOSS_WEIGHT

    rp = _rodrigues9_ref(pred_theta[:, 3:75].reshape(-1, 3))
    rg = _rodrigues9_ref(data_3d_theta[:, 3:75].reshape(-1, 3))
    loss_pose = jnp.mean((rp - rg) ** 2) * E_POSE_LOSS_WEIGHT
    loss_shape = jnp.mean((pred_theta[:, 75:] - data_3d_theta[:, 75:]) ** 2) * E_SHAPE_LOSS_WEIGHT
    return loss_kp_2d + loss_kp_3d + loss_shape + loss_pose


def _make_inputs(key, B2, B3, T, K=49):
    ks = jax.random.split(key, 10)
    data_2d = {'kp_2d': jax.random.normal(ks[0], (B2, T, K, 3), jnp.float32)}
    data_3d = {
        'kp_2d': jax.random.normal(ks[1], (B3, T, K, 3), jnp.float32),
        'kp_3d': jax.random.normal(ks[2], (B3, T, K, 3), jnp.float32),
        'theta': jax.random.normal(ks[3], (B3, T, 85), jnp.float32),
        'w_3d': (jax.random.uniform(ks[4], (B3, T)) > 0.3).astype(jnp.float32).at[0, 0].set(1.0),
        'w_smpl': (jax.random.uniform(ks[5], (B3, T)) > 0.3).astype(jnp.float32).at[0, 0].set(1.0),
    }
    generator_outputs = [
        {'theta': jax.random.normal(ks[6], (B2 + B3, T, 85), jnp.float32) * 0.5,
         'kp_2d': jax.random.normal(ks[7], (B2 + B3, T, K, 2), jnp.float32) * 0.5,
         'kp_3d': jax.random.normal(ks[8], (B2 + B3, T, K, 3), jnp.float32) * 0.5},
        {'theta': jax.random.normal(ks[6], (B2 + B3, T, 85), jnp.float32),
         'kp_2d': jax.random.normal(ks[7], (B2 + B3, T, K, 2), jnp.float32),
         'kp_3d': jax.random.normal(ks[8], (B2 + B3, T, K, 3), jnp.float32)},
    ]
    return generator_outputs, data_2d, data_3d


if __name__ == "__main__":
    key = jax.random.PRNGKey(0)
    k1, k2 = jax.random.split(key)

    # Small single-block case (full-extent lanes)
    gen_out, d2, d3 = _make_inputs(k1, B2=2, B3=2, T=4)
    gen_loss, _ = vibe_loss(gen_out, d2, d3)
    gen_loss = jax.block_until_ready(gen_loss)
    ref = vibe_loss_reference(gen_out, d2, d3)
    np.testing.assert_allclose(np.asarray(gen_loss), np.asarray(ref),
                               rtol=1e-4, atol=1e-5)

    # Moderate multi-block case (exercises padding + >=2 parallel grid steps)
    gen_out, d2, d3 = _make_inputs(k2, B2=3, B3=5, T=70)
    gen_loss, _ = vibe_loss(gen_out, d2, d3)
    gen_loss = jax.block_until_ready(gen_loss)
    ref = vibe_loss_reference(gen_out, d2, d3)
    np.testing.assert_allclose(np.asarray(gen_loss), np.asarray(ref),
                               rtol=1e-4, atol=1e-4)

    print("KERNEL_OK")
</pallas_src>

<mosaic_0001>
module attributes {stable_mosaic.version = 11 : i64} {
  func.func @_vibe_loss_kernel(%arg0: i32, %arg1: memref<2x49x16xf32, #tpu.memory_space<vmem>>, %arg2: memref<2x49x16xf32, #tpu.memory_space<vmem>>, %arg3: memref<42x16xf32, #tpu.memory_space<vmem>>, %arg4: memref<42x16xf32, #tpu.memory_space<vmem>>, %arg5: memref<3x24x16xf32, #tpu.memory_space<vmem>>, %arg6: memref<3x24x16xf32, #tpu.memory_space<vmem>>, %arg7: memref<71x16xf32, #tpu.memory_space<vmem>>, %arg8: memref<1x4xf32, #tpu.memory_space<smem>>) attributes {dimension_semantics = [#tpu.dimension_semantics<parallel>], iteration_bounds = array<i64: 1>, scalar_prefetch = 0 : i64, scratch_operands = 0 : i64, tpu.core_type = #tpu.core_type<tc>, window_params = [{transform_indices = @transform_0, window_bounds = array<i64: 2, 49, 16>}, {transform_indices = @transform_1, window_bounds = array<i64: 2, 49, 16>}, {transform_indices = @transform_2, window_bounds = array<i64: 42, 16>}, {transform_indices = @transform_3, window_bounds = array<i64: 42, 16>}, {transform_indices = @transform_4, window_bounds = array<i64: 3, 24, 16>}, {transform_indices = @transform_5, window_bounds = array<i64: 3, 24, 16>}, {transform_indices = @transform_6, window_bounds = array<i64: 71, 16>}, {transform_indices = @transform_7, window_bounds = array<i64: 1, 4>}]} {
    %c0 = arith.constant 0 : index
    %c0_0 = arith.constant 0 : index
    %c0_1 = arith.constant 0 : index
    %0 = vector.load %arg1[%c0, %c0_0, %c0_1] : memref<2x49x16xf32, #tpu.memory_space<vmem>>, vector<1x49x16xf32>
    %1 = vector.shape_cast %0 : vector<1x49x16xf32> to vector<49x16xf32>
    %c0_2 = arith.constant 0 : index
    %c0_3 = arith.constant 0 : index
    %c0_4 = arith.constant 0 : index
    %2 = vector.load %arg2[%c0_2, %c0_3, %c0_4] : memref<2x49x16xf32, #tpu.memory_space<vmem>>, vector<1x49x16xf32>
    %3 = vector.shape_cast %2 : vector<1x49x16xf32> to vector<49x16xf32>
    %4 = arith.subf %1, %3 : vector<49x16xf32>
    %c1 = arith.constant 1 : index
    %c0_5 = arith.constant 0 : index
    %c0_6 = arith.constant 0 : index
    %5 = vector.load %arg1[%c1, %c0_5, %c0_6] : memref<2x49x16xf32, #tpu.memory_space<vmem>>, vector<1x49x16xf32>
    %6 = vector.shape_cast %5 : vector<1x49x16xf32> to vector<49x16xf32>
    %c1_7 = arith.constant 1 : index
    %c0_8 = arith.constant 0 : index
    %c0_9 = arith.constant 0 : index
    %7 = vector.load %arg2[%c1_7, %c0_8, %c0_9] : memref<2x49x16xf32, #tpu.memory_space<vmem>>, vector<1x49x16xf32>
    %8 = vector.shape_cast %7 : vector<1x49x16xf32> to vector<49x16xf32>
    %9 = arith.subf %6, %8 : vector<49x16xf32>
    %c0_10 = arith.constant 0 : index
    %c0_11 = arith.constant 0 : index
    %10 = vector.load %arg7[%c0_10, %c0_11] : memref<71x16xf32, #tpu.memory_space<vmem>>, vector<49x16xf32>
    %11 = arith.mulf %4, %4 : vector<49x16xf32>
    %12 = arith.mulf %9, %9 : vector<49x16xf32>
    %13 = arith.addf %11, %12 : vector<49x16xf32>
    %14 = arith.mulf %10, %13 : vector<49x16xf32>
    %15 = vector.shape_cast %14 : vector<49x16xf32> to vector<1x49x16xf32>
    %cst = arith.constant dense<0.000000e+00> : vector<1xf32>
    %16 = vector.multi_reduction <add>, %15, %cst [1, 2] : vector<1x49x16xf32> to vector<1xf32>
    %17 = vector.shape_cast %16 : vector<1xf32> to vector<1x1x1xf32>
    %18 = vector.extract %17[0, 0, 0] : f32 from vector<1x1x1xf32>
    %c0_12 = arith.constant 0 : index
    %c0_13 = arith.constant 0 : index
    %19 = memref.load %arg8[%c0_12, %c0_13] : memref<1x4xf32, #tpu.memory_space<smem>>
    memref.store %18, %arg8[%c0_12, %c0_13] : memref<1x4xf32, #tpu.memory_space<smem>>
    %c69 = arith.constant 69 : index
    %c0_14 = arith.constant 0 : index
    %20 = vector.load %arg7[%c69, %c0_14] : memref<71x16xf32, #tpu.memory_space<vmem>>, vector<1x16xf32>
    %c0_15 = arith.constant 0 : index
    %c0_16 = arith.constant 0 : index
    %21 = vector.load %arg3[%c0_15, %c0_16] : memref<42x16xf32, #tpu.memory_space<vmem>>, vector<42x16xf32>
    %c0_17 = arith.constant 0 : index
    %c0_18 = arith.constant 0 : index
    %22 = vector.load %arg4[%c0_17, %c0_18] : memref<42x16xf32, #tpu.memory_space<vmem>>, vector<42x16xf32>
    %23 = arith.subf %21, %22 : vector<42x16xf32>
    %24 = arith.mulf %23, %23 : vector<42x16xf32>
    %cst_19 = arith.constant dense<0.000000e+00> : vector<16xf32>
    %25 = vector.multi_reduction <add>, %24, %cst_19 [0] : vector<42x16xf32> to vector<16xf32>
    %26 = vector.shape_cast %25 : vector<16xf32> to vector<1x16xf32>
    %27 = arith.mulf %20, %26 : vector<1x16xf32>
    %28 = vector.shape_cast %27 : vector<1x16xf32> to vector<1x1x16xf32>
    %cst_20 = arith.constant dense<0.000000e+00> : vector<1xf32>
    %29 = vector.multi_reduction <add>, %28, %cst_20 [1, 2] : vector<1x1x16xf32> to vector<1xf32>
    %30 = vector.shape_cast %29 : vector<1xf32> to vector<1x1x1xf32>
    %31 = vector.extract %30[0, 0, 0] : f32 from vector<1x1x1xf32>
    %c0_21 = arith.constant 0 : index
    %c1_22 = arith.constant 1 : index
    %32 = memref.load %arg8[%c0_21, %c1_22] : memref<1x4xf32, #tpu.memory_space<smem>>
    memref.store %31, %arg8[%c0_21, %c1_22] : memref<1x4xf32, #tpu.memory_space<smem>>
    %c70 = arith.constant 70 : index
    %c0_23 = arith.constant 0 : index
    %33 = vector.load %arg7[%c70, %c0_23] : memref<71x16xf32, #tpu.memory_space<vmem>>, vector<1x16xf32>
    %c0_24 = arith.constant 0 : index
    %c0_25 = arith.constant 0 : index
    %c0_26 = arith.constant 0 : index
    %34 = vector.load %arg5[%c0_24, %c0_25, %c0_26] : memref<3x24x16xf32, #tpu.memory_space<vmem>>, vector<1x24x16xf32>
    %35 = vector.shape_cast %34 : vector<1x24x16xf32> to vector<24x16xf32>
    %c1_27 = arith.constant 1 : index
    %c0_28 = arith.constant 0 : index
    %c0_29 = arith.constant 0 : index
    %36 = vector.load %arg5[%c1_27, %c0_28, %c0_29] : memref<3x24x16xf32, #tpu.memory_space<vmem>>, vector<1x24x16xf32>
    %37 = vector.shape_cast %36 : vector<1x24x16xf32> to vector<24x16xf32>
    %c2 = arith.constant 2 : index
    %c0_30 = arith.constant 0 : index
    %c0_31 = arith.constant 0 : index
    %38 = vector.load %arg5[%c2, %c0_30, %c0_31] : memref<3x24x16xf32, #tpu.memory_space<vmem>>, vector<1x24x16xf32>
    %39 = vector.shape_cast %38 : vector<1x24x16xf32> to vector<24x16xf32>
    %cst_32 = arith.constant 9.99999993E-9 : f32
    %40 = vector.broadcast %cst_32 : f32 to vector<24x16xf32>
    %41 = arith.addf %35, %40 : vector<24x16xf32>
    %cst_33 = arith.constant 9.99999993E-9 : f32
    %42 = vector.broadcast %cst_33 : f32 to vector<24x16xf32>
    %43 = arith.addf %37, %42 : vector<24x16xf32>
    %cst_34 = arith.constant 9.99999993E-9 : f32
    %44 = vector.broadcast %cst_34 : f32 to vector<24x16xf32>
    %45 = arith.addf %39, %44 : vector<24x16xf32>
    %46 = arith.mulf %41, %41 : vector<24x16xf32>
    %47 = arith.mulf %43, %43 : vector<24x16xf32>
    %48 = arith.addf %46, %47 : vector<24x16xf32>
    %49 = arith.mulf %45, %45 : vector<24x16xf32>
    %50 = arith.addf %48, %49 : vector<24x16xf32>
    %51 = math.sqrt %50 : vector<24x16xf32>
    %52 = math.rsqrt %50 : vector<24x16xf32>
    %53 = arith.mulf %35, %52 : vector<24x16xf32>
    %54 = arith.mulf %37, %52 : vector<24x16xf32>
    %55 = arith.mulf %39, %52 : vector<24x16xf32>
    %cst_35 = arith.constant 5.000000e-01 : f32
    %56 = vector.broadcast %cst_35 : f32 to vector<24x16xf32>
    %57 = arith.mulf %51, %56 : vector<24x16xf32>
    %58 = math.cos %57 : vector<24x16xf32>
    %59 = math.sin %57 : vector<24x16xf32>
    %60 = arith.mulf %59, %53 : vector<24x16xf32>
    %61 = arith.mulf %59, %54 : vector<24x16xf32>
    %62 = arith.mulf %59, %55 : vector<24x16xf32>
    %63 = arith.mulf %58, %58 : vector<24x16xf32>
    %64 = arith.mulf %60, %60 : vector<24x16xf32>
    %65 = arith.addf %63, %64 : vector<24x16xf32>
    %66 = arith.mulf %61, %61 : vector<24x16xf32>
    %67 = arith.addf %65, %66 : vector<24x16xf32>
    %68 = arith.mulf %62, %62 : vector<24x16xf32>
    %69 = arith.addf %67, %68 : vector<24x16xf32>
    %70 = math.rsqrt %69 : vector<24x16xf32>
    %71 = arith.mulf %58, %70 : vector<24x16xf32>
    %72 = arith.mulf %60, %70 : vector<24x16xf32>
    %73 = arith.mulf %61, %70 : vector<24x16xf32>
    %74 = arith.mulf %62, %70 : vector<24x16xf32>
    %c0_36 = arith.constant 0 : index
    %c0_37 = arith.constant 0 : index
    %c0_38 = arith.constant 0 : index
    %75 = vector.load %arg6[%c0_36, %c0_37, %c0_38] : memref<3x24x16xf32, #tpu.memory_space<vmem>>, vector<1x24x16xf32>
    %76 = vector.shape_cast %75 : vector<1x24x16xf32> to vector<24x16xf32>
    %c1_39 = arith.constant 1 : index
    %c0_40 = arith.constant 0 : index
    %c0_41 = arith.constant 0 : index
    %77 = vector.load %arg6[%c1_39, %c0_40, %c0_41] : memref<3x24x16xf32, #tpu.memory_space<vmem>>, vector<1x24x16xf32>
    %78 = vector.shape_cast %77 : vector<1x24x16xf32> to vector<24x16xf32>
    %c2_42 = arith.constant 2 : index
    %c0_43 = arith.constant 0 : index
    %c0_44 = arith.constant 0 : index
    %79 = vector.load %arg6[%c2_42, %c0_43, %c0_44] : memref<3x24x16xf32, #tpu.memory_space<vmem>>, vector<1x24x16xf32>
    %80 = vector.shape_cast %79 : vector<1x24x16xf32> to vector<24x16xf32>
    %cst_45 = arith.constant 9.99999993E-9 : f32
    %81 = vector.broadcast %cst_45 : f32 to vector<24x16xf32>
    %82 = arith.addf %76, %81 : vector<24x16xf32>
    %cst_46 = arith.constant 9.99999993E-9 : f32
    %83 = vector.broadcast %cst_46 : f32 to vector<24x16xf32>
    %84 = arith.addf %78, %83 : vector<24x16xf32>
    %cst_47 = arith.constant 9.99999993E-9 : f32
    %85 = vector.broadcast %cst_47 : f32 to vector<24x16xf32>
    %86 = arith.addf %80, %85 : vector<24x16xf32>
    %87 = arith.mulf %82, %82 : vector<24x16xf32>
    %88 = arith.mulf %84, %84 : vector<24x16xf32>
    %89 = arith.addf %87, %88 : vector<24x16xf32>
    %90 = arith.mulf %86, %86 : vector<24x16xf32>
    %91 = arith.addf %89, %90 : vector<24x16xf32>
    %92 = math.sqrt %91 : vector<24x16xf32>
    %93 = math.rsqrt %91 : vector<24x16xf32>
    %94 = arith.mulf %76, %93 : vector<24x16xf32>
    %95 = arith.mulf %78, %93 : vector<24x16xf32>
    %96 = arith.mulf %80, %93 : vector<24x16xf32>
    %cst_48 = arith.constant 5.000000e-01 : f32
    %97 = vector.broadcast %cst_48 : f32 to vector<24x16xf32>
    %98 = arith.mulf %92, %97 : vector<24x16xf32>
    %99 = math.cos %98 : vector<24x16xf32>
    %100 = math.sin %98 : vector<24x16xf32>
    %101 = arith.mulf %100, %94 : vector<24x16xf32>
    %102 = arith.mulf %100, %95 : vector<24x16xf32>
    %103 = arith.mulf %100, %96 : vector<24x16xf32>
    %104 = arith.mulf %99, %99 : vector<24x16xf32>
    %105 = arith.mulf %101, %101 : vector<24x16xf32>
    %106 = arith.addf %104, %105 : vector<24x16xf32>
    %107 = arith.mulf %102, %102 : vector<24x16xf32>
    %108 = arith.addf %106, %107 : vector<24x16xf32>
    %109 = arith.mulf %103, %103 : vector<24x16xf32>
    %110 = arith.addf %108, %109 : vector<24x16xf32>
    %111 = math.rsqrt %110 : vector<24x16xf32>
    %112 = arith.mulf %99, %111 : vector<24x16xf32>
    %113 = arith.mulf %101, %111 : vector<24x16xf32>
    %114 = arith.mulf %102, %111 : vector<24x16xf32>
    %115 = arith.mulf %103, %111 : vector<24x16xf32>
    %116 = arith.mulf %71, %112 : vector<24x16xf32>
    %117 = arith.mulf %72, %113 : vector<24x16xf32>
    %118 = arith.addf %116, %117 : vector<24x16xf32>
    %119 = arith.mulf %73, %114 : vector<24x16xf32>
    %120 = arith.addf %118, %119 : vector<24x16xf32>
    %121 = arith.mulf %74, %115 : vector<24x16xf32>
    %122 = arith.addf %120, %121 : vector<24x16xf32>
    %123 = arith.mulf %122, %122 : vector<24x16xf32>
    %cst_49 = arith.constant dense<0.000000e+00> : vector<16xf32>
    %124 = vector.multi_reduction <add>, %123, %cst_49 [0] : vector<24x16xf32> to vector<16xf32>
    %125 = vector.shape_cast %124 : vector<16xf32> to vector<1x16xf32>
    %cst_50 = arith.constant 2.400000e+01 : f32
    %126 = vector.broadcast %cst_50 : f32 to vector<1x16xf32>
    %127 = arith.subf %126, %125 : vector<1x16xf32>
    %cst_51 = arith.constant 8.000000e+00 : f32
    %128 = vector.broadcast %cst_51 : f32 to vector<1x16xf32>
    %129 = arith.mulf %128, %127 : vector<1x16xf32>
    %130 = arith.mulf %33, %129 : vector<1x16xf32>
    %131 = vector.shape_cast %130 : vector<1x16xf32> to vector<1x1x16xf32>
    %cst_52 = arith.constant dense<0.000000e+00> : vector<1xf32>
    %132 = vector.multi_reduction <add>, %131, %cst_52 [1, 2] : vector<1x1x16xf32> to vector<1xf32>
    %133 = vector.shape_cast %132 : vector<1xf32> to vector<1x1x1xf32>
    %134 = vector.extract %133[0, 0, 0] : f32 from vector<1x1x1xf32>
    %c0_53 = arith.constant 0 : index
    %c2_54 = arith.constant 2 : index
    %135 = memref.load %arg8[%c0_53, %c2_54] : memref<1x4xf32, #tpu.memory_space<smem>>
    memref.store %134, %arg8[%c0_53, %c2_54] : memref<1x4xf32, #tpu.memory_space<smem>>
    %c49 = arith.constant 49 : index
    %c0_55 = arith.constant 0 : index
    %136 = vector.load %arg7[%c49, %c0_55] : memref<71x16xf32, #tpu.memory_space<vmem>>, vector<10x16xf32>
    %c59 = arith.constant 59 : index
    %c0_56 = arith.constant 0 : index
    %137 = vector.load %arg7[%c59, %c0_56] : memref<71x16xf32, #tpu.memory_space<vmem>>, vector<10x16xf32>
    %138 = arith.subf %136, %137 : vector<10x16xf32>
    %139 = arith.mulf %138, %138 : vector<10x16xf32>
    %cst_57 = arith.constant dense<0.000000e+00> : vector<16xf32>
    %140 = vector.multi_reduction <add>, %139, %cst_57 [0] : vector<10x16xf32> to vector<16xf32>
    %141 = vector.shape_cast %140 : vector<16xf32> to vector<1x16xf32>
    %142 = arith.mulf %33, %141 : vector<1x16xf32>
    %143 = vector.shape_cast %142 : vector<1x16xf32> to vector<1x1x16xf32>
    %cst_58 = arith.constant dense<0.000000e+00> : vector<1xf32>
    %144 = vector.multi_reduction <add>, %143, %cst_58 [1, 2] : vector<1x1x16xf32> to vector<1xf32>
    %145 = vector.shape_cast %144 : vector<1xf32> to vector<1x1x1xf32>
    %146 = vector.extract %145[0, 0, 0] : f32 from vector<1x1x1xf32>
    %c0_59 = arith.constant 0 : index
    %c3 = arith.constant 3 : index
    %147 = memref.load %arg8[%c0_59, %c3] : memref<1x4xf32, #tpu.memory_space<smem>>
    memref.store %146, %arg8[%c0_59, %c3] : memref<1x4xf32, #tpu.memory_space<smem>>
    return
  }
  func.func @transform_0(%arg0: i32) -> (i32, i32, i32) {
    %c0_i32 = arith.constant 0 : i32
    %c0_i32_0 = arith.constant 0 : i32
    %c0_i32_1 = arith.constant 0 : i32
    return %c0_i32, %c0_i32_0, %arg0 : i32, i32, i32
  }
  func.func @transform_1(%arg0: i32) -> (i32, i32, i32) {
    %c0_i32 = arith.constant 0 : i32
    %c0_i32_0 = arith.constant 0 : i32
    %c0_i32_1 = arith.constant 0 : i32
    return %c0_i32, %c0_i32_0, %arg0 : i32, i32, i32
  }
  func.func @transform_2(%arg0: i32) -> (i32, i32) {
    %c0_i32 = arith.constant 0 : i32
    %c0_i32_0 = arith.constant 0 : i32
    return %c0_i32, %arg0 : i32, i32
  }
  func.func @transform_3(%arg0: i32) -> (i32, i32) {
    %c0_i32 = arith.constant 0 : i32
    %c0_i32_0 = arith.constant 0 : i32
    return %c0_i32, %arg0 : i32, i32
  }
  func.func @transform_4(%arg0: i32) -> (i32, i32, i32) {
    %c0_i32 = arith.constant 0 : i32
    %c0_i32_0 = arith.constant 0 : i32
    %c0_i32_1 = arith.constant 0 : i32
    return %c0_i32, %c0_i32_0, %arg0 : i32, i32, i32
  }
  func.func @transform_5(%arg0: i32) -> (i32, i32, i32) {
    %c0_i32 = arith.constant 0 : i32
    %c0_i32_0 = arith.constant 0 : i32
    %c0_i32_1 = arith.constant 0 : i32
    return %c0_i32, %c0_i32_0, %arg0 : i32, i32, i32
  }
  func.func @transform_6(%arg0: i32) -> (i32, i32) {
    %c0_i32 = arith.constant 0 : i32
    %c0_i32_0 = arith.constant 0 : i32
    return %c0_i32, %arg0 : i32, i32
  }
  func.func @transform_7(%arg0: i32) -> (i32, i32) {
    %c0_i32 = arith.constant 0 : i32
    %c0_i32_0 = arith.constant 0 : i32
    return %arg0, %c0_i32 : i32, i32
  }
}

</mosaic_0001>

<bundles_post_ra>
// kernel: tpu_custom_call.1
= control target key start
LH: loop header
LB: loop body
LE: loop exit
PB: predicated region body
PF: predicated region fallthrough
CT: control target
= control target key end

     0   :  { %vm3041_vm0 = vcmask 130048   ;;  %vm3039_vm1 = vcmask 122880   ;;  %vm3040_vm2 = vcmask 123904   ;;  %s3031_s0 = inlined_call_operand.vmem [shape: f32[2,49,16], index: 0, kind: input, shape index: {}]   ;;  %s3032_s1 = inlined_call_operand.vmem [shape: f32[2,49,16], index: 1, kind: input, shape index: {}]   ;;  %s3033_s2 = inlined_call_operand.vmem [shape: f32[42,16], index: 2, kind: input, shape index: {}]   ;;  %s3034_s3 = inlined_call_operand.vmem [shape: f32[42,16], index: 3, kind: input, shape index: {}]   ;;  %s3035_s4 = inlined_call_operand.vmem [shape: f32[3,24,16], index: 4, kind: input, shape index: {}]   ;;  %s3036_s5 = inlined_call_operand.vmem [shape: f32[3,24,16], index: 5, kind: input, shape index: {}]   ;;  %s3037_s6 = inlined_call_operand.vmem [shape: f32[71,16], index: 6, kind: input, shape index: {}]   ;;  %s3038_s7 = inlined_call_operand.hbm [shape: f32[1,4], index: 7, kind: output, shape index: {}]  }
   0x1   :  { %v27_v0 = vld [vmem:[%s3031_s0] sm:$0xff]  ;;  %v28_v1 = vld [vmem:[%s3031_s0 + $0x8] sm:$0xff]  ;;  %v29_v2 = vld [vmem:[%s3031_s0 + $0x10] sm:$0xff] }
   0x2   :  { %v30_v3 = vld [vmem:[%s3031_s0 + $0x18] sm:$0xff]  ;;  %v31_v4 = vld [vmem:[%s3031_s0 + $0x20] sm:$0xff]  ;;  %v32_v5 = vld [vmem:[%s3031_s0 + $0x28] sm:$0xff] }
   0x3   :  { %v33_v6 = vld [vmem:[%s3031_s0 + $0x30] sm:$0x1]  ;;  %v34_v7 = vld [vmem:[%s3032_s1] sm:$0xff]  ;;  %v35_v8 = vld [vmem:[%s3032_s1 + $0x8] sm:$0xff] }
   0x4   :  { %v36_v9 = vld [vmem:[%s3032_s1 + $0x10] sm:$0xff]  ;;  %v37_v10 = vld [vmem:[%s3032_s1 + $0x18] sm:$0xff]  ;;  %v38_v11 = vld [vmem:[%s3032_s1 + $0x20] sm:$0xff]  ;;  %v41_v12 = vsub.f32 %v27_v0, %v34_v7  ;;  %v42_v13 = vsub.f32 %v28_v1, %v35_v8 }
   0x5   :  { %v39_v14 = vld [vmem:[%s3032_s1 + $0x28] sm:$0xff]  ;;  %v40_v15 = vld [vmem:[%s3032_s1 + $0x30] sm:$0x1]  ;;  %v43_v16 = vsub.f32 %v29_v2, %v36_v9  ;;  %v44_v17 = vsub.f32 %v30_v3, %v37_v10  ;;  %v45_v18 = vsub.f32 %v31_v4, %v38_v11  ;;  %v1756_v19 = vld [vmem:[%s3031_s0 + $0x38] sm:$0xff] }
   0x6   :  { %v46_v20 = vsub.f32 %v32_v5, %v39_v14  ;;  %v47_v21 = vsub.f32 %v33_v6, %v40_v15  ;;  %v1757_v22 = vld [vmem:[%s3031_s0 + $0x40] sm:$0xff]  ;;  %v1758_v23 = vld [vmem:[%s3031_s0 + $0x48] sm:$0xff]  ;;  %v1759_v24 = vld [vmem:[%s3031_s0 + $0x50] sm:$0xff]  ;;  %v78_v28 = vmul.f32 %v41_v12, %v41_v12  ;;  %v79_v32 = vmul.f32 %v42_v13, %v42_v13 }
   0x7   :  { %v1760_v25 = vld [vmem:[%s3031_s0 + $0x58] sm:$0xff]  ;;  %v1761_v26 = vld [vmem:[%s3031_s0 + $0x60] sm:$0xff]  ;;  %v1762_v27 = vld [vmem:[%s3031_s0 + $0x68] sm:$0x1]  ;;  %v80_v33 = vmul.f32 %v43_v16, %v43_v16  ;;  %v81_v34 = vmul.f32 %v44_v17, %v44_v17  ;;  %v82_v35 = vmul.f32 %v45_v18, %v45_v18 }
   0x8   :  { %v1763_v29 = vld [vmem:[%s3032_s1 + $0x38] sm:$0xff]  ;;  %v1764_v30 = vld [vmem:[%s3032_s1 + $0x40] sm:$0xff]  ;;  %v1765_v31 = vld [vmem:[%s3032_s1 + $0x48] sm:$0xff]  ;;  %v83_v42 = vmul.f32 %v46_v20, %v46_v20  ;;  %v84_v47 = vmul.f32 %v47_v21, %v47_v21 }
   0x9   :  { %v1766_v36 = vld [vmem:[%s3032_s1 + $0x50] sm:$0xff]  ;;  %v1767_v37 = vld [vmem:[%s3032_s1 + $0x58] sm:$0xff]  ;;  %v1768_v38 = vld [vmem:[%s3032_s1 + $0x60] sm:$0xff]  ;;  %v64_v39 = vsub.f32 %v1756_v19, %v1763_v29  ;;  %v65_v40 = vsub.f32 %v1757_v22, %v1764_v30  ;;  %v66_v41 = vsub.f32 %v1758_v23, %v1765_v31 }
   0xa   :  { %v1769_v43 = vld [vmem:[%s3032_s1 + $0x68] sm:$0x1]  ;;  %v67_v44 = vsub.f32 %v1759_v24, %v1766_v36  ;;  %v68_v45 = vsub.f32 %v1760_v25, %v1767_v37  ;;  %v69_v46 = vsub.f32 %v1761_v26, %v1768_v38  ;;  %v71_v49 = vld [vmem:[%s3037_s6] sm:$0xff]  ;;  %v73_v54 = vld [vmem:[%s3037_s6 + $0x10] sm:$0xff] }
   0xb   :  { %v70_v48 = vsub.f32 %v1762_v27, %v1769_v43  ;;  %v72_v50 = vld [vmem:[%s3037_s6 + $0x8] sm:$0xff]  ;;  %v85_v51 = vmul.f32 %v64_v39, %v64_v39  ;;  %v86_v52 = vmul.f32 %v65_v40, %v65_v40  ;;  %v87_v53 = vmul.f32 %v66_v41, %v66_v41  ;;  %v74_v55 = vld [vmem:[%s3037_s6 + $0x18] sm:$0xff]  ;;  %v75_v56 = vld [vmem:[%s3037_s6 + $0x20] sm:$0xff] }
   0xc   :  { %v88_v57 = vmul.f32 %v67_v44, %v67_v44  ;;  %v89_v58 = vmul.f32 %v68_v45, %v68_v45  ;;  %v90_v59 = vmul.f32 %v69_v46, %v69_v46  ;;  %v76_v60 = vld [vmem:[%s3037_s6 + $0x28] sm:$0xff]  ;;  %v77_v61 = vld [vmem:[%s3037_s6 + $0x30] sm:$0x1]  ;;  %v133_v2 = vld [vmem:[%s3033_s2] sm:$0xff] }
   0xd   :  { %v91_v62 = vmul.f32 %v70_v48, %v70_v48  ;;  %v92_v63 = vadd.f32 %v85_v51, %v78_v28  ;;  %v93_v0 = vadd.f32 %v86_v52, %v79_v32  ;;  %v94_v1 = vadd.f32 %v87_v53, %v80_v33  ;;  %v134_v6 = vld [vmem:[%s3033_s2 + $0x8] sm:$0xff]  ;;  %v135_v7 = vld [vmem:[%s3033_s2 + $0x10] sm:$0xff]  ;;  %v136_v8 = vld [vmem:[%s3033_s2 + $0x18] sm:$0xff] }
   0xe   :  { %v95_v3 = vadd.f32 %v88_v57, %v81_v34  ;;  %v96_v4 = vadd.f32 %v89_v58, %v82_v35  ;;  %v97_v5 = vadd.f32 %v90_v59, %v83_v42  ;;  %v137_v13 = vld [vmem:[%s3033_s2 + $0x20] sm:$0xff]  ;;  %v138_v14 = vld [vmem:[%s3033_s2 + $0x28] sm:$0x3]  ;;  %v141_v20 = vld [vmem:[%s3034_s3 + $0x10] sm:$0xff] }
   0xf   :  { %v98_v9 = vadd.f32 %v91_v62, %v84_v47  ;;  %v99_v10 = vmul.f32 %v92_v63, %v71_v49  ;;  %v100_v11 = vmul.f32 %v93_v0, %v72_v50  ;;  %v101_v12 = vmul.f32 %v94_v1, %v73_v54  ;;  %v139_v15 = vld [vmem:[%s3034_s3] sm:$0xff]  ;;  %v140_v19 = vld [vmem:[%s3034_s3 + $0x8] sm:$0xff]  ;;  %v142_v21 = vld [vmem:[%s3034_s3 + $0x18] sm:$0xff] }
  0x10   :  { %v102_v16 = vmul.f32 %v95_v3, %v74_v55  ;;  %v103_v17 = vmul.f32 %v96_v4, %v75_v56  ;;  %v104_v18 = vmul.f32 %v97_v5, %v76_v60  ;;  %v145_v22 = vsub.f32 %v133_v2, %v139_v15  ;;  %v143_v27 = vld [vmem:[%s3034_s3 + $0x20] sm:$0xff]  ;;  %v144_v28 = vld [vmem:[%s3034_s3 + $0x28] sm:$0x3]  ;;  %v2146_v46 = vld [vmem:[%s3035_s4 + $0x10] sm:$0xff] }
  0x11   :  { %v105_v23 = vmul.f32 %v98_v9, %v77_v61  ;;  %v107_v24 = vsel %vm3041_vm0, %v99_v10, 0.0  ;;  %v108_v25 = vsel %vm3041_vm0, %v100_v11, 0.0  ;;  %v110_v26 = vsel %vm3041_vm0, %v101_v12, 0.0  ;;  %v2135_v33 = vld [vmem:[%s3035_s4] sm:$0xff]  ;;  %v2141_v42 = vld [vmem:[%s3035_s4 + $0x8] sm:$0xff]  ;;  %v2153_v52 = vld [vmem:[%s3035_s4 + $0x18] sm:$0xff] }
  0x12   :  { %v109_v29 = vadd.f32 %v108_v25, %v107_v24  ;;  %v112_v30 = vsel %vm3041_vm0, %v102_v16, 0.0  ;;  %v114_v31 = vsel %vm3041_vm0, %v103_v17, 0.0  ;;  %v116_v32 = vsel %vm3041_vm0, %v104_v18, 0.0  ;;  %v2158_v53 = vld [vmem:[%s3035_s4 + $0x20] sm:$0xff]  ;;  %v2163_v54 = vld [vmem:[%s3035_s4 + $0x28] sm:$0xff]  ;;  %v1773_v58 = vld [vmem:[%s3035_s4 + $0x30] sm:$0xff] }
  0x13   :  { %v119_v34 = vsel %vm3039_vm1, %v105_v23, 0.0  ;;  %v146_v35 = vsub.f32 %v134_v6, %v140_v19  ;;  %v147_v36 = vsub.f32 %v135_v7, %v141_v20  ;;  %v148_v37 = vsub.f32 %v136_v8, %v142_v21  ;;  %v2177_v0 = vld [vmem:[%s3035_s4 + $0x38] sm:$0xff]  ;;  %v2182_v1 = vld [vmem:[%s3035_s4 + $0x40] sm:$0xff] }
  0x14   :  { %v111_v38 = vadd.f32 %v110_v26, %v109_v29  ;;  %v149_v39 = vsub.f32 %v137_v13, %v143_v27  ;;  %v150_v40 = vsub.f32 %v138_v14, %v144_v28  ;;  %v151_v41 = vmul.f32 %v145_v22, %v145_v22 }
  0x15   :  { %v152_v43 = vmul.f32 %v146_v35, %v146_v35  ;;  %v153_v44 = vmul.f32 %v147_v36, %v147_v36  ;;  %v154_v45 = vmul.f32 %v148_v37, %v148_v37  ;;  %v200_v47 = vadd.f32 1e-08, %v2135_v33 }
  0x16   :  { %v113_v48 = vadd.f32 %v112_v30, %v111_v38  ;;  %v155_v49 = vmul.f32 %v149_v39, %v149_v39  ;;  %v156_v50 = vmul.f32 %v150_v40, %v150_v40  ;;  %v157_v51 = vsel %vm3041_vm0, %v151_v41, 0.0 }
  0x17   :  { %v158_v55 = vsel %vm3041_vm0, %v152_v43, 0.0  ;;  %v160_v56 = vsel %vm3041_vm0, %v153_v44, 0.0  ;;  %v162_v57 = vsel %vm3041_vm0, %v154_v45, 0.0  ;;  %v201_v59 = vadd.f32 1e-08, %v2141_v42 }
  0x18   :  { %v115_v60 = vadd.f32 %v114_v31, %v113_v48  ;;  %v159_v61 = vadd.f32 %v158_v55, %v157_v51  ;;  %v164_v62 = vsel %vm3041_vm0, %v155_v49, 0.0  ;;  %v167_v63 = vsel %vm3040_vm2, %v156_v50, 0.0 }
  0x19   :  { %12 = vsyncpa [#allocation3], 0  ;;  %v202_v2 = vadd.f32 1e-08, %v2146_v46  ;;  %v203_v3 = vadd.f32 1e-08, %v2153_v52  ;;  %v209_v5 = vmul.f32 %v200_v47, %v200_v47  ;;  %v210_v12 = vmul.f32 %v201_v59, %v201_v59 }
  0x1a   :  { %v204_v4 = vadd.f32 1e-08, %v2158_v53  ;;  %v117_v6 = vadd.f32 %v116_v32, %v115_v60  ;;  %v161_v7 = vadd.f32 %v160_v56, %v159_v61  ;;  %v205_v8 = vadd.f32 1e-08, %v2163_v54  ;;  %v132_v36 = vld [vmem:[%s3037_s6 + $0x45] sm:$0x1] }
  0x1b   :  { %v206_v9 = vadd.f32 1e-08, %v1773_v58  ;;  %v207_v10 = vadd.f32 1e-08, %v2177_v0  ;;  %v208_v11 = vadd.f32 1e-08, %v2182_v1  ;;  %v211_v13 = vmul.f32 %v202_v2, %v202_v2 }
  0x1c   :  { %v120_v14 = vadd.f32 %v119_v34, %v117_v6  ;;  %v163_v15 = vadd.f32 %v162_v57, %v161_v7  ;;  %v212_v16 = vmul.f32 %v203_v3, %v203_v3  ;;  %v213_v17 = vmul.f32 %v204_v4, %v204_v4  ;;  %v928_v3 = vld [vmem:[%s3036_s5 + $0x10] sm:$0xff]  ;;  %v1801_v6 = vld [vmem:[%s3036_s5 + $0x20] sm:$0xff]  ;;  %s1926_s10 = scalar_lea.hbm %s3038_s7, 16 }
  0x1d   :  { %v214_v18 = vmul.f32 %v205_v8, %v205_v8  ;;  %v218_v19 = vmul.f32 %v206_v9, %v206_v9  ;;  %v219_v20 = vmul.f32 %v207_v10, %v207_v10  ;;  %v220_v21 = vmul.f32 %v208_v11, %v208_v11  ;;  %v1803_v7 = vld [vmem:[%s3036_s5 + $0x30] sm:$0xff]  ;;  %p1927_p0 = scmp.ne.s32.totalorder %s3038_s7, %s1926_s10  ;;  %p1930_p1 = scmp.lt.u32.totalorder %s1926_s10, %s3038_s7 }
  0x1e   :  { %121 = vadd.xlane.f32.xlu0 %v120_v14  ;;  %v165_v22 = vadd.f32 %v164_v62, %v163_v15  ;;  %v215_v23 = vadd.f32 %v212_v16, %v209_v5  ;;  %v216_v24 = vadd.f32 %v213_v17, %v210_v12  ;;  %v1804_v15 = vld [vmem:[%s3036_s5 + $0x38] sm:$0xff]  ;;  %v939_v16 = vadd.f32 1e-08, %v928_v3 }
  0x1f   :  { %v217_v25 = vadd.f32 %v214_v18, %v211_v13  ;;  %v1805_v18 = vld [vmem:[%s3036_s5 + $0x40] sm:$0xff]  ;;  %p1932_p2 = pnand %p1930_p1, %p1927_p0 }
  0x20   :  { %v168_v26 = vadd.f32 %v167_v63, %v165_v22  ;;  %v221_v27 = vadd.f32 %v218_v19, %v215_v23  ;;  %v222_v28 = vadd.f32 %v219_v20, %v216_v24  ;;  %v941_v20 = vadd.f32 1e-08, %v1801_v6 }
  0x21   :  { %v223_v29 = vadd.f32 %v220_v21, %v217_v25  ;;  %v1940_v6 = vmov 2131351028  }
  0x22   :  { %v169_v30 = vrot.slane %v168_v26, 4  ;;  %1869 = vrsqrt.f32 %v221_v27  ;;  %vm226_vm3 = vcmp.eq.f32.partialorder %v221_v27, inf  ;;  %vm228_vm4 = vcmp.eq.f32.partialorder %v221_v27, 0.0 }
  0x23   :  { %1871 = vrsqrt.f32 %v222_v28  ;;  %v229_v37 = vand.u32 2147483648, %v221_v27  ;;  %vm233_vm5 = vcmp.eq.f32.partialorder %v222_v28, inf  ;;  %vm235_vm6 = vcmp.eq.f32.partialorder %v222_v28, 0.0 }
  0x24   :  { %v170_v31 = vadd.f32 %v169_v30, %v168_v26  ;;  %1873 = vrsqrt.f32 %v223_v29  ;;  %v236_v38 = vand.u32 2147483648, %v222_v28  ;;  %vm240_vm7 = vcmp.eq.f32.partialorder %v223_v29, inf }
  0x25   :  { %vm242_vm8 = vcmp.eq.f32.partialorder %v223_v29, 0.0  ;;  %v243_v41 = vand.u32 2147483648, %v223_v29  ;;  %v2270_v30 = vadd.f32 1e-08, %v1805_v18 }
  0x26   :  { %v171_v32 = vrot.slane %v170_v31, 2 }
  0x28   :  { %v172_v34 = vadd.f32 %v171_v32, %v170_v31 }
  0x2a   :  { %v173_v35 = vrot.slane %v172_v34, 1 }
  0x2c   :  { %v1870_v39 = vpop.eup %1869  ;;  %v174_v40 = vadd.f32 %v173_v35, %v172_v34 }
  0x2d   :  { %v1872_v43 = vpop.eup %1871  ;;  %v225_v44 = vmul.f32 %v1870_v39, %v221_v27  ;;  %v2194_v45 = vmul.f32 %v1870_v39, %v2135_v33  ;;  %v2197_v47 = vmul.f32 %v1870_v39, %v2153_v52  ;;  %v2199_v48 = vmul.f32 %v1870_v39, %v1773_v58  ;;  %v926_v58 = vld [vmem:[%s3036_s5] sm:$0xff] }
  0x2e   :  { %v1874_v49 = vpop.eup %1873  ;;  %v175_v50 = vmul.f32 %v174_v40, %v132_v36  ;;  %v232_v51 = vmul.f32 %v1872_v43, %v222_v28  ;;  %v2202_v55 = vmul.f32 %v1872_v43, %v2141_v42  ;;  %v2205_v56 = vmul.f32 %v1872_v43, %v2158_v53 }
  0x2f   :  { %v227_v57 = vsel %vm226_vm3, %v221_v27, %v225_v44  ;;  %v239_v59 = vmul.f32 %v1874_v49, %v223_v29  ;;  %v2209_v33 = vmul.f32 %v1874_v49, %v2146_v46  ;;  %v2212_v52 = vmul.f32 %v1874_v49, %v2163_v54  ;;  %v927_v46 = vld [vmem:[%s3036_s5 + $0x8] sm:$0xff] }
  0x30   :  { %v176_v60 = vsel %vm3039_vm1, %v175_v50, 0.0  ;;  %v230_v42 = vsel %vm228_vm4, %v229_v37, %v227_v57  ;;  %v234_v53 = vsel %vm233_vm5, %v222_v28, %v232_v51  ;;  %v2221_v61 = vmul.f32 %v1872_v43, %v2177_v0  ;;  %v1800_v0 = vld [vmem:[%s3036_s5 + $0x18] sm:$0xff] }
  0x31   :  { %177 = vadd.xlane.f32.xlu0 %v176_v60  ;;  %v237_v54 = vsel %vm235_vm6, %v236_v38, %v234_v53  ;;  %v241_v62 = vsel %vm240_vm7, %v223_v29, %v239_v59  ;;  %v2229_v63 = vmul.f32 %v1874_v49, %v2182_v1  ;;  %v2231_v2 = vmul.f32 0.5, %v230_v42  ;;  %v1802_v1 = vld [vmem:[%s3036_s5 + $0x28] sm:$0xff] }
  0x32   :  { %v244_v4 = vsel %vm242_vm8, %v243_v41, %v241_v62  ;;  %v2240_v5 = vmul.f32 0.5, %v237_v54  ;;  %v937_v8 = vadd.f32 1e-08, %v926_v58  ;;  %v938_v12 = vadd.f32 1e-08, %v927_v46 }
  0x33   :  { %v2251_v9 = vmul.f32 0.5, %v244_v4  ;;  %v260_v10 = vand.u32 2147483647, %v2231_v2  ;;  %v263_v11 = vand.u32 2139095040, %v2231_v2  ;;  %v940_v19 = vadd.f32 1e-08, %v1800_v0 }
  0x34   :  { %v363_v13 = vand.u32 2147483647, %v2240_v5  ;;  %v366_v14 = vand.u32 2139095040, %v2240_v5  ;;  %v942_v26 = vadd.f32 1e-08, %v1802_v1  ;;  %v2272_v34 = vmul.f32 %v937_v8, %v937_v8 }
  0x35   :  { %v264_v17 = vshrl.u32 %v263_v11, 23  ;;  %v267_v21 = vand.u32 8388607, %v260_v10  ;;  %v469_v25 = vand.u32 2139095040, %v2251_v9  ;;  %v943_v27 = vadd.f32 1e-08, %v1803_v7 }
  0x36   :  { %v367_v22 = vshrl.u32 %v366_v14, 23  ;;  %v370_v23 = vand.u32 8388607, %v363_v13  ;;  %v2268_v29 = vadd.f32 1e-08, %v1804_v15  ;;  %v2274_v35 = vmul.f32 %v938_v12, %v938_v12 }
  0x37   :  { %v1776_v24 = vadd.s32 4294967169, %v264_v17  ;;  %v470_v32 = vshrl.u32 %v469_v25, 23  ;;  %v268_v36 = vor.u32 8388608, %v267_v21  ;;  %v2276_v39 = vmul.f32 %v939_v16, %v939_v16 }
  0x38   :  { %v1780_v28 = vadd.s32 4294967169, %v367_v22  ;;  %v371_v37 = vor.u32 8388608, %v370_v23  ;;  %v2278_v41 = vmul.f32 %v940_v19, %v940_v19  ;;  %v2280_v43 = vmul.f32 %v941_v20, %v941_v20 }
  0x39   :  { %v270_v31 = vadd.s32 1, %v1776_v24  ;;  %v1784_v40 = vadd.s32 4294967169, %v470_v32  ;;  %v2282_v49 = vmul.f32 %v942_v26, %v942_v26  ;;  %v2284_v50 = vmul.f32 %v943_v27, %v943_v27 }
  0x3a   :  { %v373_v38 = vadd.s32 1, %v1780_v28  ;;  %v466_v58 = vand.u32 2147483647, %v2251_v9  ;;  %v2287_v60 = vshll.u32 %v268_v36, 8  ;;  %v2289_v53 = vshll.u32 %v371_v37, 8 }
  0x3b   :  { %vm271_vm9 = vcmp.gt.s32.totalorder %v270_v31, 0  ;;  %v2291_v46 = vadd.s32 1, %v1784_v40  ;;  %v1938_v62 = vmov 683565275   ;;  %v1939_v0 = vmov 2475754826  }
  0x3c   :  { %v272_v44 = vsel %vm271_vm9, %v270_v31, 0  ;;  %vm374_vm10 = vcmp.gt.s32.totalorder %v373_v38, 0  ;;  %v1941_v7 = vmov 2102212464   ;;  %v1942_v11 = vmov 920167782  }
  0x3d   :  { %v273_v51 = vshrl.u32 %v272_v44, 5  ;;  %v274_v57 = vand.u32 31, %v272_v44  ;;  %v375_v59 = vsel %vm374_vm10, %v373_v38, 0  ;;  %v1943_v20 = vmov 1326507024  }
  0x3e   :  { %v377_v42 = vand.u32 31, %v375_v59  ;;  %v2298_v14 = vshrl.u32 %v375_v59, 5  ;;  %vm477_vm7 = vcmp.gt.s32.totalorder %v2291_v46, 0  ;;  %vm455_vm0 = vweird.f32 %v2240_v5 }
  0x3f   :  { %v275_v54 = vsub.s32 32, %v274_v57  ;;  %v277_v3 = vshll.u32 %v1938_v62, %v274_v57  ;;  %v280_v4 = vshll.u32 %v1939_v0, %v274_v57  ;;  %v283_v1 = vshll.u32 %v1940_v6, %v274_v57 }
  0x40   :  { %v286_v8 = vshll.u32 %v1941_v7, %v274_v57  ;;  %v289_v12 = vshll.u32 %v1942_v11, %v274_v57  ;;  %vm292_vm11 = vcmp.lt.s32.totalorder %v273_v51, 1  ;;  %vm293_vm12 = vcmp.lt.s32.totalorder %v273_v51, 2 }
  0x41   :  { %v276_v15 = vshrl.u32 %v1938_v62, %v275_v54  ;;  %v278_v16 = vshrl.u32 %v1939_v0, %v275_v54  ;;  %v281_v17 = vshrl.u32 %v1940_v6, %v275_v54  ;;  %v284_v18 = vshrl.u32 %v1941_v7, %v275_v54 }
  0x42   :  { %v287_v19 = vshrl.u32 %v1942_v11, %v275_v54  ;;  %v290_v21 = vshrl.u32 %v1943_v20, %v275_v54  ;;  %vm295_vm13 = vcmp.lt.s32.totalorder %v273_v51, 4  ;;  %v378_v25 = vsub.s32 32, %v377_v42 }
  0x43   :  { %v279_v22 = vor.u32 %v278_v16, %v277_v3  ;;  %v282_v23 = vor.u32 %v281_v17, %v280_v4  ;;  %v285_v24 = vor.u32 %v284_v18, %v283_v1  ;;  %vm294_vm14 = vcmp.lt.s32.totalorder %v273_v51, 3 }
  0x44   :  { %v288_v26 = vor.u32 %v287_v19, %v286_v8  ;;  %v291_v27 = vor.u32 %v290_v21, %v289_v12  ;;  %v380_v28 = vshll.u32 %v1938_v62, %v377_v42  ;;  %v383_v57 = vshll.u32 %v1939_v0, %v377_v42 }
  0x45   :  { %v296_v31 = vsel %vm292_vm11, %v276_v15, %v279_v22  ;;  %v297_v32 = vsel %vm295_vm13, %v285_v24, 2102212464  ;;  %v300_v36 = vsel %vm292_vm11, %v279_v22, %v282_v23  ;;  %v304_v37 = vsel %vm292_vm11, %v282_v23, %v285_v24 }
  0x46   :  { %v298_v38 = vsel %vm294_vm14, %v282_v23, %v297_v32  ;;  %v301_v40 = vsel %vm295_vm13, %v288_v26, 920167782  ;;  %v305_v44 = vsel %vm295_vm13, %v291_v27, 1326507024  ;;  %v379_v3 = vshrl.u32 %v1938_v62, %v378_v25 }
  0x47   :  { %v302_v59 = vsel %vm294_vm14, %v285_v24, %v301_v40  ;;  %v306_v54 = vsel %vm294_vm14, %v288_v26, %v305_v44  ;;  %v381_v4 = vshrl.u32 %v1939_v0, %v378_v25  ;;  %v299_v1 = vsel %vm293_vm12, %v296_v31, %v298_v38 }
  0x48   :  { %v303_v8 = vsel %vm293_vm12, %v300_v36, %v302_v59  ;;  %v307_v12 = vsel %vm293_vm12, %v304_v37, %v306_v54  ;;  %v384_v15 = vshrl.u32 %v1940_v6, %v378_v25  ;;  %v386_v23 = vshll.u32 %v1940_v6, %v377_v42 }
  0x49   :  { %v2318_v16 = vmul.u32.u64.low %v2287_v60, %v307_v12  ;;  %v2319_v17 = vmul.u32.u64.high %v2287_v60, %v307_v12, %v2318_v16  ;;  %v2322_v18 = vmul.u32.u64.low %v2287_v60, %v303_v8  ;;  %v2323_v19 = vmul.u32.u64.high %v2287_v60, %v303_v8, %v2322_v18 }
  0x4a   :  { %v382_v21 = vor.u32 %v381_v4, %v380_v28  ;;  %v385_v22 = vor.u32 %v384_v15, %v383_v57  ;;  %v387_v24 = vshrl.u32 %v1941_v7, %v378_v25  ;;  %v389_v51 = vshll.u32 %v1941_v7, %v377_v42 }
  0x4b   :  { %v390_v26 = vshrl.u32 %v1942_v11, %v378_v25  ;;  %v392_v27 = vshll.u32 %v1942_v11, %v377_v42  ;;  %v393_v31 = vshrl.u32 %v1943_v20, %v378_v25  ;;  %v315_v32 = vmul.u32 %v2287_v60, %v299_v1 }
  0x4c   :  { %v388_v36 = vor.u32 %v387_v24, %v386_v23  ;;  %vm395_vm15 = vcmp.lt.s32.totalorder %v2298_v14, 1  ;;  %vm396_vm3 = vcmp.lt.s32.totalorder %v2298_v14, 2  ;;  %vm317_vm4 = vc.u32 %v2319_v17, %v2322_v18 }
  0x4d   :  { %v318_v28 = vadd.s32 1, %v2323_v19  ;;  %v391_v37 = vor.u32 %v390_v26, %v389_v51  ;;  %vm397_vm5 = vcmp.lt.s32.totalorder %v2298_v14, 3  ;;  %v394_v38 = vor.u32 %v393_v31, %v392_v27 }
  0x4e   :  { %vm398_vm6 = vcmp.lt.s32.totalorder %v2298_v14, 4  ;;  %v399_v42 = vsel %vm395_vm15, %v379_v3, %v382_v21  ;;  %v403_v25 = vsel %vm395_vm15, %v382_v21, %v385_v22  ;;  %v407_v57 = vsel %vm395_vm15, %v385_v22, %v388_v36 }
  0x4f   :  { %v319_v60 = vsel %vm317_vm4, %v318_v28, %v2323_v19  ;;  %v400_v40 = vsel %vm398_vm6, %v388_v36, 2102212464  ;;  %v404_v44 = vsel %vm398_vm6, %v391_v37, 920167782  ;;  %v408_v1 = vsel %vm398_vm6, %v394_v38, 1326507024 }
  0x50   :  { %v320_v59 = vadd.s32 %v319_v60, %v315_v32  ;;  %v401_v54 = vsel %vm397_vm5, %v385_v22, %v400_v40  ;;  %v405_v4 = vsel %vm397_vm5, %v388_v36, %v404_v44  ;;  %v409_v15 = vsel %vm397_vm5, %v391_v37, %v408_v1 }
  0x51   :  { %v402_v8 = vsel %vm396_vm3, %v399_v42, %v401_v54  ;;  %v406_v12 = vsel %vm396_vm3, %v403_v25, %v405_v4  ;;  %v410_v16 = vsel %vm396_vm3, %v407_v57, %v409_v15  ;;  %v478_v24 = vsel %vm477_vm7, %v2291_v46, 0 }
  0x52   :  { %v321_v3 = vadd.s32 536870912, %v320_v59  ;;  %v2349_v19 = vmul.u32.u64.low %v2289_v53, %v406_v12  ;;  %v2350_v21 = vmul.u32.u64.high %v2289_v53, %v406_v12, %v2349_v19  ;;  %v952_v51 = vadd.f32 %v2278_v41, %v2272_v34 }
  0x53   :  { %v2354_v22 = vmul.u32.u64.low %v2289_v53, %v410_v16  ;;  %v2355_v23 = vmul.u32.u64.high %v2289_v53, %v410_v16, %v2354_v22  ;;  %v480_v27 = vand.u32 31, %v478_v24  ;;  %v418_v14 = vmul.u32 %v2289_v53, %v402_v8 }
  0x54   :  { %v2360_v26 = vshrl.u32 %v321_v3, 30  ;;  %v473_v31 = vand.u32 8388607, %v466_v58  ;;  %v953_v32 = vadd.f32 %v2280_v43, %v2274_v35  ;;  %v956_v36 = vmul.f32 %v2268_v29, %v2268_v29 }
  0x55   :  { %v421_v46 = vadd.s32 1, %v2350_v21  ;;  %v481_v37 = vsub.s32 32, %v480_v27  ;;  %vm420_vm8 = vc.u32 %v2355_v23, %v2349_v19  ;;  %v954_v34 = vadd.f32 %v2282_v49, %v2276_v39 }
  0x56   :  { %v323_v28 = vshll.u32 %v2360_v26, 30  ;;  %v957_v41 = vmul.f32 %v2270_v30, %v2270_v30  ;;  %v2378_v53 = vadd.f32 %v2284_v50, %v952_v51  ;;  %v474_v38 = vor.u32 8388608, %v473_v31 }
  0x57   :  { %v422_v29 = vsel %vm420_vm8, %v421_v46, %v2350_v21  ;;  %v483_v42 = vshll.u32 %v1938_v62, %v480_v27  ;;  %v2384_v25 = vadd.f32 %v956_v36, %v953_v32  ;;  %v484_v39 = vshrl.u32 %v1939_v0, %v481_v37 }
  0x58   :  { %v2380_v35 = vsub.s32 %v320_v59, %v323_v28  ;;  %v423_v43 = vadd.s32 %v422_v29, %v418_v14  ;;  %v486_v49 = vshll.u32 %v1939_v0, %v480_v27  ;;  %v487_v30 = vshrl.u32 %v1940_v6, %v481_v37 }
  0x59   :  { %v492_v40 = vshll.u32 %v1941_v7, %v480_v27  ;;  %v2391_v44 = vadd.f32 %v957_v41, %v954_v34  ;;  %1875 = vrsqrt.f32 %v2378_v53  ;;  %v479_v59 = vshrl.u32 %v478_v24, 5 }
  0x5a   :  { %v326_v60 = vsub.s32 0, %v2380_v35  ;;  %v424_v50 = vadd.s32 536870912, %v423_v43  ;;  %v489_v54 = vshll.u32 %v1940_v6, %v480_v27  ;;  %v490_v4 = vshrl.u32 %v1941_v7, %v481_v37 }
  0x5b   :  { %v493_v8 = vshrl.u32 %v1942_v11, %v481_v37  ;;  %v966_v12 = vand.u32 2147483648, %v2378_v53  ;;  %1877 = vrsqrt.f32 %v2384_v25  ;;  %v485_v3 = vor.u32 %v484_v39, %v483_v42 }
  0x5c   :  { %v1777_v57 = vmin.u32 %v326_v60, %v2380_v35  ;;  %v2397_v1 = vshrl.u32 %v424_v50, 30  ;;  %v488_v16 = vor.u32 %v487_v30, %v486_v49  ;;  %v2402_v21 = vshll.u32 %v474_v38, 8 }
  0x5d   :  { %v494_v24 = vor.u32 %v493_v8, %v492_v40  ;;  %v495_v51 = vshll.u32 %v1942_v11, %v480_v27  ;;  %v496_v14 = vshrl.u32 %v1943_v20, %v481_v37  ;;  %v491_v32 = vor.u32 %v490_v4, %v489_v54 }
  0x5e   :  { %v328_v15 = vclz %v1777_v57  ;;  %v426_v22 = vshll.u32 %v2397_v1, 30  ;;  %vm498_vm9 = vcmp.lt.s32.totalorder %v479_v59, 1  ;;  %vm501_vm10 = vcmp.lt.s32.totalorder %v479_v59, 4 }
  0x5f   :  { %v316_v36 = vadd.s32 %v2322_v18, %v2319_v17  ;;  %v482_v46 = vshrl.u32 %v1938_v62, %v481_v37  ;;  %vm500_vm11 = vcmp.lt.s32.totalorder %v479_v59, 3  ;;  %vm499_vm13 = vcmp.lt.s32.totalorder %v479_v59, 2 }
  0x60   :  { %v1778_v31 = vadd.s32 4294967294, %v328_v15  ;;  %v2409_v28 = vsub.s32 %v423_v43, %v426_v22  ;;  %v503_v34 = vsel %vm501_vm10, %v491_v32, 2102212464  ;;  %v507_v27 = vsel %vm501_vm10, %v494_v24, 920167782 }
  0x61   :  { %v497_v38 = vor.u32 %v496_v14, %v495_v51  ;;  %v506_v42 = vsel %vm498_vm9, %v485_v3, %v488_v16  ;;  %v508_v43 = vsel %vm500_vm11, %v491_v32, %v507_v27  ;;  %vm262_vm14 = vcmp.lt.s32.totalorder %v2231_v2, 0 }
  0x62   :  { %vm1779_vm12 = vcmp.lt.s32.totalorder %v1778_v31, 0  ;;  %v429_v29 = vsub.s32 0, %v2409_v28  ;;  %v502_v49 = vsel %vm498_vm9, %v482_v46, %v485_v3  ;;  %v504_v30 = vsel %vm500_vm11, %v488_v16, %v503_v34 }
  0x63   :  { %v331_v41 = vsel %vm1779_vm12, 0, %v1778_v31  ;;  %v2418_v37 = vpop.eup %1875  ;;  %v509_v57 = vsel %vm499_vm13, %v506_v42, %v508_v43  ;;  %v510_v54 = vsel %vm498_vm9, %v488_v16, %v491_v32  ;;  %vm963_vm15 = vcmp.eq.f32.partialorder %v2378_v53, inf }
  0x64   :  { %v332_v60 = vsub.s32 32, %v331_v41  ;;  %v333_v17 = vshll.u32 %v2380_v35, %v331_v41  ;;  %v336_v18 = vsub.s32 4294967266, %v331_v41  ;;  %v1781_v39 = vmin.u32 %v429_v29, %v2409_v28 }
  0x65   :  { %v2427_v35 = vpop.eup %1877  ;;  %v511_v8 = vsel %vm501_vm10, %v497_v38, 1326507024  ;;  %v2431_v15 = vmul.u32.u64.low %v2402_v21, %v509_v57  ;;  %v2432_v22 = vmul.u32.u64.high %v2402_v21, %v509_v57, %v2431_v15  ;;  %1879 = vrsqrt.f32 %v2391_v44 }
  0x66   :  { %v334_v50 = vshrl.u32 %v316_v36, %v332_v60  ;;  %v337_v40 = vadd.s32 127, %v336_v18  ;;  %v431_v4 = vclz %v1781_v39  ;;  %v512_v14 = vsel %vm500_vm11, %v494_v24, %v511_v8 }
  0x67   :  { %v346_v16 = vsub.s32 4, %v2360_v26  ;;  %v505_v32 = vsel %vm499_vm13, %v502_v49, %v504_v30  ;;  %v513_v36 = vsel %vm499_vm13, %v510_v54, %v512_v14  ;;  %vm965_vm3 = vcmp.eq.f32.partialorder %v2378_v53, 0.0 }
  0x68   :  { %v335_v3 = vor.u32 %v334_v50, %v333_v17  ;;  %v338_v51 = vshll.u32 %v337_v40, 23  ;;  %v1782_v31 = vadd.s32 4294967294, %v431_v4  ;;  %v419_v24 = vadd.s32 %v2349_v19, %v2355_v23 }
  0x69   :  { %v2442_v27 = vmul.u32.u64.low %v2402_v21, %v513_v36  ;;  %v2443_v41 = vmul.u32.u64.high %v2402_v21, %v513_v36, %v2442_v27  ;;  %v449_v29 = vsub.s32 4, %v2397_v1  ;;  %v524_v38 = vadd.s32 1, %v2432_v22 }
  0x6a   :  { %v339_v46 = vor.u32 4788187, %v338_v51  ;;  %v342_v34 = vcvt.s32.f32 %v335_v3  ;;  %vm1783_vm4 = vcmp.lt.s32.totalorder %v1782_v31, 0  ;;  %v521_v59 = vmul.u32 %v2402_v21, %v505_v32 }
  0x6b   :  { %v434_v60 = vsel %vm1783_vm4, 0, %v1782_v31  ;;  %v962_v17 = vmul.f32 %v2418_v37, %v2378_v53  ;;  %v347_v18 = vsel %vm262_vm14, %v346_v16, %v2360_v26  ;;  %vm2458_vm5 = vcmp.le.f32.partialorder %v260_v10, 0.7853982 }
  0x6c   :  { %v340_v42 = vand.u32 2147483647, %v339_v46  ;;  %v435_v43 = vsub.s32 32, %v434_v60  ;;  %v436_v39 = vshll.u32 %v2409_v28, %v434_v60  ;;  %v439_v19 = vsub.s32 4294967266, %v434_v60 }
  0x6d   :  { %vm365_vm6 = vcmp.lt.s32.totalorder %v2240_v5, 0  ;;  %vm523_vm7 = vc.u32 %v2443_v41, %v2431_v15  ;;  %v349_v10 = vsel %vm2458_vm5, 0, %v347_v18  ;;  %vm2473_vm8 = vcmp.le.f32.partialorder %v363_v13, 0.7853982 }
  0x6e   :  { %v343_v49 = vmul.f32 %v342_v34, %v340_v42  ;;  %v437_v21 = vshrl.u32 %v419_v24, %v435_v43  ;;  %v440_v30 = vadd.s32 127, %v439_v19  ;;  %v450_v26 = vsel %vm365_vm6, %v449_v29, %v2397_v1 }
  0x6f   :  { %v525_v28 = vsel %vm523_vm7, %v524_v38, %v2432_v22  ;;  %v964_v8 = vsel %vm963_vm15, %v2378_v53, %v962_v17  ;;  %vm970_vm9 = vcmp.eq.f32.partialorder %v2384_v25, inf  ;;  %v2481_v1 = vpop.eup %1879  ;;  %v452_v13 = vsel %vm2473_vm8, 0, %v450_v26 }
  0x70   :  { %v344_v50 = vxor.u32 2147483648, %v343_v49  ;;  %v526_v57 = vadd.s32 %v525_v28, %v521_v59  ;;  %v438_v54 = vor.u32 %v437_v21, %v436_v39  ;;  %v441_v4 = vshll.u32 %v440_v30, 23 }
  0x71   :  { %v969_v51 = vmul.f32 %v2427_v35, %v2384_v25  ;;  %v662_v32 = vadd.s32 3, %v349_v10  ;;  %v2492_v36 = vand.u32 3, %v349_v10  ;;  %v967_v34 = vsel %vm965_vm3, %v966_v12, %v964_v8 }
  0x72   :  { %v345_v22 = vsel %vm262_vm14, %v344_v50, %v343_v49  ;;  %v527_v3 = vadd.s32 536870912, %v526_v57  ;;  %v442_v16 = vor.u32 4788187, %v441_v4  ;;  %v445_v31 = vcvt.s32.f32 %v438_v54 }
  0x73   :  { %v348_v14 = vsel %vm2458_vm5, %v2231_v2, %v345_v22  ;;  %vm3042_vm10 = vcmp.lt.s32.totalorder %v2251_v9, 0  ;;  %vm972_vm11 = vcmp.eq.f32.partialorder %v2384_v25, 0.0  ;;  %v766_v29 = vadd.s32 3, %v452_v13 }
  0x74   :  { %1881 = vcosq.f32 %v348_v14  ;;  %v528_v46 = vshrl.u32 %v527_v3, 30  ;;  %v443_v27 = vand.u32 2147483647, %v442_v16  ;;  %v971_v38 = vsel %vm970_vm9, %v2384_v25, %v969_v51 }
  0x75   :  { %1883 = vsinq.f32 %v348_v14  ;;  %v973_v42 = vand.u32 2147483648, %v2384_v25  ;;  %vm2506_vm12 = vcmp.le.f32.partialorder %v466_v58, 0.7853982  ;;  %v663_v12 = vand.u32 3, %v662_v32 }
  0x76   :  { %v529_v24 = vshll.u32 %v528_v46, 30  ;;  %v446_v60 = vmul.f32 %v445_v31, %v443_v27  ;;  %vm977_vm13 = vcmp.eq.f32.partialorder %v2391_v44, inf  ;;  %v2511_v59 = vmul.f32 0.5, %v967_v34 }
  0x77   :  { %vm354_vm14 = vcmp.lt.s32.totalorder %v2492_v36, 2  ;;  %v976_v18 = vmul.f32 %v2481_v1, %v2391_v44  ;;  %vm979_vm15 = vcmp.eq.f32.partialorder %v2391_v44, 0.0  ;;  %vm355_vm3 = vcmp.eq.s32.totalorder %v2492_v36, 0 }
  0x78   :  { %v2514_v17 = vsub.s32 %v526_v57, %v529_v24  ;;  %vm358_vm4 = vcmp.eq.s32.totalorder %v2492_v36, 2  ;;  %v447_v58 = vxor.u32 2147483648, %v446_v60  ;;  %v552_v43 = vsub.s32 4, %v528_v46 }
  0x79   :  { %vm352_vm5 = vweird.f32 %v2231_v2  ;;  %v2522_v39 = vand.u32 3, %v452_v13  ;;  %v2525_v23 = vand.u32 3, %v766_v29  ;;  %v1000_v49 = vand.u32 2139095040, %v2511_v59 }
  0x7a   :  { %v532_v19 = vsub.s32 0, %v2514_v17  ;;  %v448_v21 = vsel %vm365_vm6, %v447_v58, %v446_v60  ;;  %vm664_vm7 = vcmp.lt.s32.totalorder %v663_v12, 2  ;;  %v974_v30 = vsel %vm972_vm11, %v973_v42, %v971_v38 }
  0x7b   :  { %v980_v26 = vand.u32 2147483648, %v2391_v44  ;;  %v451_v28 = vsel %vm2473_vm8, %v2240_v5, %v448_v21  ;;  %v522_v50 = vadd.s32 %v2431_v15, %v2443_v41  ;;  %v978_v57 = vsel %vm977_vm13, %v2391_v44, %v976_v18 }
  0x7c   :  { %v1785_v10 = vmin.u32 %v532_v19, %v2514_v17  ;;  %1885 = vcosq.f32 %v451_v28  ;;  %v553_v25 = vsel %vm3042_vm10, %v552_v43, %v528_v46  ;;  %v997_v54 = vand.u32 2147483647, %v2511_v59 }
  0x7d   :  { %v1001_v4 = vshrl.u32 %v1000_v49, 23  ;;  %1887 = vsinq.f32 %v451_v28  ;;  %vm665_vm6 = vcmp.eq.s32.totalorder %v663_v12, 0  ;;  %vm668_vm8 = vcmp.eq.s32.totalorder %v663_v12, 2 }
  0x7e   :  { %v1882_v8 = vpop.eup %1881  ;;  %v534_v40 = vclz %v1785_v10  ;;  %vm461_vm9 = vcmp.eq.s32.totalorder %v2522_v39, 2  ;;  %vm772_vm11 = vcmp.eq.s32.totalorder %v2525_v23, 2  ;;  %v2549_v41 = vsel %vm979_vm15, %v980_v26, %v978_v57 }
  0x7f   :  { %v1884_v22 = vpop.eup %1883  ;;  %v359_v15 = vxor.u32 2147483648, %v1882_v8  ;;  %v2551_v13 = vmul.f32 0.5, %v974_v30  ;;  %vm458_vm13 = vcmp.eq.s32.totalorder %v2522_v39, 0  ;;  %v555_v14 = vsel %vm2506_vm12, 0, %v553_v25 }
  0x80   :  { %v356_v3 = vxor.u32 2147483648, %v1884_v22  ;;  %v1786_v51 = vadd.s32 4294967294, %v534_v40  ;;  %vm769_vm1 = vcmp.eq.s32.totalorder %v2525_v23, 0  ;;  %v1806_v16 = vadd.s32 4294967169, %v1001_v4 }
  0x81   :  { %v360_v31 = vsel %vm358_vm4, %v359_v15, %v1884_v22  ;;  %vm457_vm2 = vcmp.lt.s32.totalorder %v2522_v39, 2  ;;  %v2560_v44 = vand.u32 3, %v555_v14  ;;  %v670_v32 = vsel %vm668_vm8, %v359_v15, %v1884_v22 }
  0x82   :  { %vm768_vm15 = vcmp.lt.s32.totalorder %v2525_v23, 2  ;;  %v2566_v46 = vand.u32 8388607, %v997_v54  ;;  %v357_v34 = vsel %vm355_vm3, %v1882_v8, %v356_v3  ;;  %vm1787_vm10 = vcmp.lt.s32.totalorder %v1786_v51, 0 }
  0x83   :  { %v667_v27 = vsel %vm665_vm6, %v1882_v8, %v356_v3  ;;  %v1007_v24 = vadd.s32 1, %v1806_v16  ;;  %v361_v29 = vsel %vm354_vm14, %v357_v34, %v360_v31  ;;  %v537_v38 = vsel %vm1787_vm10, 0, %v1786_v51 }
  0x84   :  { %v671_v42 = vsel %vm664_vm7, %v667_v27, %v670_v32  ;;  %v1103_v60 = vand.u32 2139095040, %v2551_v13  ;;  %v2578_v18 = vsel %vm352_vm5, nan, %v361_v29  ;;  %v538_v58 = vsub.s32 32, %v537_v38 }
  0x85   :  { %v539_v43 = vshll.u32 %v2514_v17, %v537_v38  ;;  %v542_v19 = vsub.s32 4294967266, %v537_v38  ;;  %v672_v49 = vsel %vm352_vm5, nan, %v671_v42  ;;  %v2583_v21 = vadd.s32 3, %v555_v14 }
  0x86   :  { %v1005_v36 = vor.u32 8388608, %v2566_v46  ;;  %vm1008_vm10 = vcmp.gt.s32.totalorder %v1007_v24, 0  ;;  %v540_v12 = vshrl.u32 %v522_v50, %v538_v58  ;;  %v2587_v26 = vmul.f32 %v672_v49, %v2194_v45  ;;  %v1886_v10 = vpop.eup %1885 }
  0x87   :  { %v543_v30 = vadd.s32 127, %v542_v19  ;;  %v2590_v28 = vmul.f32 %v672_v49, %v2197_v47  ;;  %v2593_v17 = vmul.f32 %v672_v49, %v2199_v48  ;;  %v890_v2 = vmul.f32 %v2578_v18, %v2578_v18  ;;  %v1888_v4 = vpop.eup %1887 }
  0x88   :  { %v1009_v57 = vsel %vm1008_vm10, %v1007_v24, 0  ;;  %v1104_v25 = vshrl.u32 %v1103_v60, 23  ;;  %v462_v8 = vxor.u32 2147483648, %v1886_v10  ;;  %v541_v40 = vor.u32 %v540_v12, %v539_v43 }
  0x89   :  { %v544_v50 = vshll.u32 %v543_v30, 23  ;;  %v893_v45 = vmul.f32 %v2587_v26, %v2587_v26  ;;  %v459_v22 = vxor.u32 2147483648, %v1888_v4  ;;  %v899_v47 = vmul.f32 %v2590_v28, %v2590_v28 }
  0x8a   :  { %v905_v48 = vmul.f32 %v2593_v17, %v2593_v17  ;;  %v2603_v15 = vshrl.u32 %v1009_v57, 5  ;;  %v463_v3 = vsel %vm461_vm9, %v462_v8, %v1888_v4  ;;  %v548_v14 = vcvt.s32.f32 %v541_v40 }
  0x8b   :  { %v545_v51 = vor.u32 4788187, %v544_v50  ;;  %v774_v16 = vsel %vm772_vm11, %v462_v8, %v1888_v4  ;;  %v460_v31 = vsel %vm458_vm13, %v1886_v10, %v459_v22  ;;  %v771_v32 = vsel %vm769_vm1, %v1886_v10, %v459_v22 }
  0x8c   :  { %v896_v34 = vadd.f32 %v893_v45, %v890_v2  ;;  %v1011_v27 = vand.u32 31, %v1009_v57  ;;  %v464_v24 = vsel %vm457_vm2, %v460_v31, %v463_v3  ;;  %v775_v38 = vsel %vm768_vm15, %v771_v32, %v774_v16 }
  0x8d   :  { %v546_v29 = vand.u32 2147483647, %v545_v51  ;;  %v1810_v42 = vadd.s32 4294967169, %v1104_v25  ;;  %v2619_v60 = vsel %vm455_vm0, nan, %v464_v24  ;;  %v776_v58 = vsel %vm455_vm0, nan, %v775_v38 }
  0x8e   :  { %v902_v43 = vadd.f32 %v899_v47, %v896_v34  ;;  %v1012_v19 = vsub.s32 32, %v1011_v27  ;;  %v2624_v12 = vmul.f32 %v776_v58, %v2202_v55  ;;  %v2627_v39 = vmul.f32 %v776_v58, %v2205_v56 }
  0x8f   :  { %v549_v49 = vmul.f32 %v548_v14, %v546_v29  ;;  %v2630_v23 = vmul.f32 %v776_v58, %v2221_v61  ;;  %v891_v30 = vmul.f32 %v2619_v60, %v2619_v60  ;;  %v1014_v2 = vshll.u32 %v1938_v62, %v1011_v27 }
  0x90   :  { %v908_v10 = vadd.f32 %v905_v48, %v902_v43  ;;  %vm1029_vm0 = vcmp.lt.s32.totalorder %v2603_v15, 1  ;;  %v894_v57 = vmul.f32 %v2624_v12, %v2624_v12  ;;  %v900_v55 = vmul.f32 %v2627_v39, %v2627_v39 }
  0x91   :  { %v550_v5 = vxor.u32 2147483648, %v549_v49  ;;  %v906_v56 = vmul.f32 %v2630_v23, %v2630_v23  ;;  %v1015_v61 = vshrl.u32 %v1939_v0, %v1012_v19  ;;  %v1017_v25 = vshll.u32 %v1939_v0, %v1011_v27 }
  0x92   :  { %1889 = vrsqrt.f32 %v908_v10  ;;  %v1018_v4 = vshrl.u32 %v1940_v6, %v1012_v19  ;;  %vm3049_vm1 = vcmp.lt.s32.totalorder %v2251_v9, 0  ;;  %v897_v40 = vadd.f32 %v894_v57, %v891_v30 }
  0x93   :  { %v551_v8 = vsel %vm3049_vm1, %v550_v5, %v549_v49  ;;  %v1020_v50 = vshll.u32 %v1940_v6, %v1011_v27  ;;  %v1021_v45 = vshrl.u32 %v1941_v7, %v1012_v19  ;;  %v1016_v47 = vor.u32 %v1015_v61, %v1014_v2 }
  0x94   :  { %v554_v22 = vsel %vm2506_vm12, %v2251_v9, %v551_v8  ;;  %v1019_v48 = vor.u32 %v1018_v4, %v1017_v25  ;;  %v1023_v3 = vshll.u32 %v1941_v7, %v1011_v27  ;;  %v903_v51 = vadd.f32 %v900_v55, %v897_v40 }
  0x95   :  { %1891 = vcosq.f32 %v554_v22  ;;  %v1022_v14 = vor.u32 %v1021_v45, %v1020_v50  ;;  %v1024_v16 = vshrl.u32 %v1942_v11, %v1012_v19  ;;  %v1013_v31 = vshrl.u32 %v1938_v62, %v1012_v19 }
  0x96   :  { %1893 = vsinq.f32 %v554_v22  ;;  %v1026_v32 = vshll.u32 %v1942_v11, %v1011_v27  ;;  %v1027_v34 = vshrl.u32 %v1943_v20, %v1012_v19  ;;  %v909_v24 = vadd.f32 %v906_v56, %v903_v51 }
  0x97   :  { %v1025_v29 = vor.u32 %v1024_v16, %v1023_v3  ;;  %vm1031_vm2 = vcmp.lt.s32.totalorder %v2603_v15, 3  ;;  %vm1032_vm12 = vcmp.lt.s32.totalorder %v2603_v15, 4  ;;  %vm561_vm14 = vcmp.eq.s32.totalorder %v2560_v44, 0 }
  0x98   :  { %v1028_v53 = vor.u32 %v1027_v34, %v1026_v32  ;;  %vm1030_vm3 = vcmp.lt.s32.totalorder %v2603_v15, 2  ;;  %v1037_v38 = vsel %vm1029_vm0, %v1016_v47, %v1019_v48  ;;  %v2665_v58 = vshll.u32 %v1005_v36, 8 }
  0x99   :  { %1895 = vrsqrt.f32 %v909_v24  ;;  %v1034_v27 = vsel %vm1032_vm12, %v1022_v14, 2102212464  ;;  %v1038_v43 = vsel %vm1032_vm12, %v1025_v29, 920167782  ;;  %v1041_v19 = vsel %vm1029_vm0, %v1019_v48, %v1022_v14 }
  0x9a   :  { %vm558_vm4 = vweird.f32 %v2251_v9  ;;  %v871_v49 = vand.u32 3, %v2583_v21  ;;  %v1039_v30 = vsel %vm1031_vm2, %v1022_v14, %v1038_v43  ;;  %v1042_v10 = vsel %vm1032_vm12, %v1028_v53, 1326507024 }
  0x9b   :  { %v1100_v2 = vand.u32 2147483647, %v2551_v13  ;;  %v1033_v46 = vsel %vm1029_vm0, %v1013_v31, %v1016_v47  ;;  %v1040_v36 = vsel %vm1030_vm3, %v1037_v38, %v1039_v30  ;;  %v1043_v5 = vsel %vm1031_vm2, %v1025_v29, %v1042_v10 }
  0x9c   :  { %v1110_v57 = vadd.s32 1, %v1810_v42  ;;  %v1890_v55 = vpop.eup %1889  ;;  %v1035_v21 = vsel %vm1031_vm2, %v1019_v48, %v1034_v27  ;;  %v1044_v56 = vsel %vm1030_vm3, %v1041_v19, %v1043_v5  ;;  %vm564_vm7 = vcmp.eq.s32.totalorder %v2560_v44, 2 }
  0x9d   :  { %v2685_v61 = vmul.u32.u64.low %v2665_v58, %v1040_v36  ;;  %v2686_v25 = vmul.u32.u64.high %v2665_v58, %v1040_v36, %v2685_v61  ;;  %v2690_v4 = vmul.f32 %v1890_v55, %v2578_v18  ;;  %v2693_v8 = vmul.f32 %v1890_v55, %v2587_v26 }
  0x9e   :  { %v2696_v42 = vmul.f32 %v1890_v55, %v2590_v28  ;;  %v2699_v40 = vmul.f32 %v1890_v55, %v2593_v17  ;;  %v2702_v50 = vmul.u32.u64.low %v2665_v58, %v1044_v56  ;;  %v2703_v45 = vmul.u32.u64.high %v2665_v58, %v1044_v56, %v2702_v50 }
  0x9f   :  { %v2707_v22 = vand.u32 8388607, %v1100_v2  ;;  %vm1111_vm5 = vcmp.gt.s32.totalorder %v1110_v57, 0  ;;  %v1892_v18 = vpop.eup %1891  ;;  %vm873_vm6 = vcmp.eq.s32.totalorder %v871_v49, 0  ;;  %vm876_vm8 = vcmp.eq.s32.totalorder %v871_v49, 2 }
  0xa0   :  { %v1112_v26 = vsel %vm1111_vm5, %v1110_v57, 0  ;;  %v1894_v28 = vpop.eup %1893  ;;  %v565_v47 = vxor.u32 2147483648, %v1892_v18  ;;  %v1036_v17 = vsel %vm1030_vm3, %v1033_v46, %v1035_v21  ;;  %v1055_v48 = vadd.s32 1, %v2686_v25 }
  0xa1   :  { %v1114_v3 = vand.u32 31, %v1112_v26  ;;  %vm560_vm9 = vcmp.lt.s32.totalorder %v2560_v44, 2  ;;  %v562_v51 = vxor.u32 2147483648, %v1894_v28  ;;  %vm872_vm11 = vcmp.lt.s32.totalorder %v871_v49, 2 }
  0xa2   :  { %v2715_v14 = vmul.f32 0.5, %v2549_v41  ;;  %v566_v16 = vsel %vm564_vm7, %v565_v47, %v1894_v28  ;;  %v878_v31 = vsel %vm876_vm8, %v565_v47, %v1894_v28  ;;  %vm1054_vm13 = vc.u32 %v2703_v45, %v2685_v61 }
  0xa3   :  { %v1108_v32 = vor.u32 8388608, %v2707_v22  ;;  %v2720_v34 = vpop.eup %1895  ;;  %v563_v15 = vsel %vm561_vm14, %v1892_v18, %v562_v51  ;;  %v875_v24 = vsel %vm873_vm6, %v1892_v18, %v562_v51  ;;  %v1052_v29 = vmul.u32 %v2665_v58, %v1036_v17 }
  0xa4   :  { %v1115_v53 = vsub.s32 32, %v1114_v3  ;;  %v567_v38 = vsel %vm560_vm9, %v563_v15, %v566_v16  ;;  %v879_v41 = vsel %vm872_vm11, %v875_v24, %v878_v31  ;;  %v2728_v27 = vmul.f32 %v2720_v34, %v2624_v12 }
  0xa5   :  { %v1056_v43 = vsel %vm1054_vm13, %v1055_v48, %v2686_v25  ;;  %v2733_v19 = vsel %vm558_vm4, nan, %v567_v38  ;;  %v880_v44 = vsel %vm558_vm4, nan, %v879_v41  ;;  %v2739_v49 = vmul.f32 %v2720_v34, %v2627_v39 }
  0xa6   :  { %v2743_v58 = vmul.f32 %v2720_v34, %v2630_v23  ;;  %v2746_v12 = vmul.f32 %v880_v44, %v2209_v33  ;;  %v2749_v30 = vmul.f32 %v880_v44, %v2212_v52  ;;  %v2752_v10 = vmul.f32 %v880_v44, %v2229_v63 }
  0xa7   :  { %v892_v9 = vmul.f32 %v2733_v19, %v2733_v19  ;;  %v1057_v46 = vadd.s32 %v1056_v43, %v1052_v29  ;;  %v1113_v36 = vshrl.u32 %v1112_v26, 5  ;;  %v1117_v39 = vshll.u32 %v1938_v62, %v1114_v3 }
  0xa8   :  { %v1118_v5 = vshrl.u32 %v1939_v0, %v1115_v53  ;;  %v895_v23 = vmul.f32 %v2746_v12, %v2746_v12  ;;  %v901_v33 = vmul.f32 %v2749_v30, %v2749_v30  ;;  %v907_v52 = vmul.f32 %v2752_v10, %v2752_v10 }
  0xa9   :  { %v1120_v63 = vshll.u32 %v1939_v0, %v1114_v3  ;;  %v1058_v57 = vadd.s32 536870912, %v1057_v46  ;;  %v1121_v21 = vshrl.u32 %v1940_v6, %v1115_v53  ;;  %v1123_v56 = vshll.u32 %v1940_v6, %v1114_v3 }
  0xaa   :  { %v1119_v55 = vor.u32 %v1118_v5, %v1117_v39  ;;  %v898_v25 = vadd.f32 %v895_v23, %v892_v9  ;;  %v1124_v50 = vshrl.u32 %v1941_v7, %v1115_v53  ;;  %v1126_v22 = vshll.u32 %v1941_v7, %v1114_v3 }
  0xab   :  { %v1127_v18 = vshrl.u32 %v1942_v11, %v1115_v53  ;;  %v2770_v26 = vshrl.u32 %v1058_v57, 30  ;;  %v1122_v28 = vor.u32 %v1121_v21, %v1120_v63  ;;  %v1129_v47 = vshll.u32 %v1942_v11, %v1114_v3 }
  0xac   :  { %v1130_v17 = vshrl.u32 %v1943_v20, %v1115_v53  ;;  %v904_v48 = vadd.f32 %v901_v33, %v898_v25  ;;  %vm1132_vm15 = vcmp.lt.s32.totalorder %v1113_v36, 1  ;;  %v1206_v16 = vand.u32 2139095040, %v2715_v14 }
  0xad   :  { %v1128_v51 = vor.u32 %v1127_v18, %v1126_v22  ;;  %v1060_v31 = vshll.u32 %v2770_v26, 30  ;;  %v1125_v15 = vor.u32 %v1124_v50, %v1123_v56  ;;  %v1148_v24 = vshll.u32 %v1108_v32, 8 }
  0xae   :  { %v910_v29 = vadd.f32 %v907_v52, %v904_v48  ;;  %v1131_v38 = vor.u32 %v1130_v17, %v1129_v47  ;;  %vm1134_vm10 = vcmp.lt.s32.totalorder %v1113_v36, 3  ;;  %vm1135_vm0 = vcmp.lt.s32.totalorder %v1113_v36, 4 }
  0xaf   :  { %v1061_v41 = vsub.s32 %v1057_v46, %v1060_v31  ;;  %v1116_v43 = vshrl.u32 %v1938_v62, %v1115_v53  ;;  %vm1133_vm1 = vcmp.lt.s32.totalorder %v1113_v36, 2  ;;  %v1140_v3 = vsel %vm1132_vm15, %v1119_v55, %v1122_v28 }
  0xb0   :  { %1897 = vrsqrt.f32 %v910_v29  ;;  %v1137_v44 = vsel %vm1135_vm0, %v1125_v15, 2102212464  ;;  %v1141_v9 = vsel %vm1135_vm0, %v1128_v51, 920167782  ;;  %v1207_v39 = vshrl.u32 %v1206_v16, 23 }
  0xb1   :  { %v1063_v5 = vsub.s32 0, %v1061_v41  ;;  %v1142_v23 = vsel %vm1134_vm10, %v1125_v15, %v1141_v9  ;;  %v1144_v32 = vsel %vm1132_vm15, %v1122_v28, %v1125_v15  ;;  %v1145_v52 = vsel %vm1135_vm0, %v1131_v38, 1326507024 }
  0xb2   :  { %v1143_v33 = vsel %vm1133_vm1, %v1140_v3, %v1142_v23  ;;  %v1136_v46 = vsel %vm1132_vm15, %v1116_v43, %v1119_v55  ;;  %v1138_v53 = vsel %vm1134_vm10, %v1122_v28, %v1137_v44  ;;  %v1146_v57 = vsel %vm1134_vm10, %v1128_v51, %v1145_v52 }
  0xb3   :  { %v1807_v63 = vmin.u32 %v1063_v5, %v1061_v41  ;;  %v2784_v21 = vmul.u32.u64.low %v1148_v24, %v1143_v33  ;;  %v2785_v56 = vmul.u32.u64.high %v1148_v24, %v1143_v33, %v2784_v21  ;;  %v1814_v25 = vadd.s32 4294967169, %v1207_v39 }
  0xb4   :  { %v1147_v22 = vsel %vm1133_vm1, %v1144_v32, %v1146_v57  ;;  %v1203_v18 = vand.u32 2147483647, %v2715_v14  ;;  %v1139_v47 = vsel %vm1133_vm1, %v1136_v46, %v1138_v53  ;;  %v1053_v51 = vadd.s32 %v2685_v61, %v2703_v45 }
  0xb5   :  { %v1065_v50 = vclz %v1807_v63  ;;  %v2791_v17 = vmul.u32.u64.low %v1148_v24, %v1147_v22  ;;  %v2792_v48 = vmul.u32.u64.high %v1148_v24, %v1147_v22, %v2791_v17  ;;  %v1213_v55 = vadd.s32 1, %v1814_v25 }
  0xb6   :  { %v1158_v28 = vadd.s32 1, %v2785_v56  ;;  %v1155_v31 = vmul.u32 %v1148_v24, %v1139_v47  ;;  %v1210_v15 = vand.u32 8388607, %v1203_v18  ;;  %v1083_v38 = vsub.s32 4, %v2770_v26 }
  0xb7   :  { %v1808_v16 = vadd.s32 4294967294, %v1065_v50  ;;  %vm1214_vm2 = vcmp.gt.s32.totalorder %v1213_v55, 0  ;;  %vm1157_vm14 = vc.u32 %v2792_v48, %v2784_v21  ;;  %vm999_vm3 = vcmp.lt.s32.totalorder %v2511_v59, 0 }
  0xb8   :  { %v1215_v43 = vsel %vm1214_vm2, %v1213_v55, 0  ;;  %v1159_v39 = vsel %vm1157_vm14, %v1158_v28, %v2785_v56  ;;  %v1211_v32 = vor.u32 8388608, %v1210_v15  ;;  %vm2825_vm4 = vcmp.le.f32.partialorder %v997_v54, 0.7853982 }
  0xb9   :  { %vm1809_vm12 = vcmp.lt.s32.totalorder %v1808_v16, 0  ;;  %v1160_v5 = vadd.s32 %v1159_v39, %v1155_v31  ;;  %v1217_v23 = vand.u32 31, %v1215_v43  ;;  %v1216_v50 = vshrl.u32 %v1215_v43, 5 }
  0xba   :  { %v2799_v29 = vpop.eup %1897  ;;  %v1068_v36 = vsel %vm1809_vm12, 0, %v1808_v16  ;;  %v1156_v46 = vadd.s32 %v2784_v21, %v2792_v48  ;;  %v1917_v21 = vld [vmem:[%s3036_s5] sm:$0xff]  ;;  %vm1089_vm13 = vweird.f32 %v2511_v59  ;;  %vm2890_vm14 = vcmp.le.f32.partialorder %v1100_v2, 0.7853982 }
  0xbb   :  { %v2806_v3 = vmul.f32 %v2799_v29, %v2746_v12  ;;  %v2810_v61 = vmul.f32 %v2799_v29, %v2749_v30  ;;  %v2814_v45 = vmul.f32 %v2799_v29, %v2752_v10  ;;  %v1069_v24 = vsub.s32 32, %v1068_v36 }
  0xbc   :  { %v1070_v44 = vshll.u32 %v1061_v41, %v1068_v36  ;;  %v1073_v9 = vsub.s32 4294967266, %v1068_v36  ;;  %v1084_v30 = vsel %vm999_vm3, %v1083_v38, %v2770_v26  ;;  %v1161_v52 = vadd.s32 536870912, %v1160_v5 }
  0xbd   :  { %v1071_v33 = vshrl.u32 %v1053_v51, %v1069_v24  ;;  %v1218_v63 = vsub.s32 32, %v1217_v23  ;;  %v1220_v10 = vshll.u32 %v1938_v62, %v1217_v23  ;;  %v1223_v41 = vshll.u32 %v1939_v0, %v1217_v23 }
  0xbe   :  { %v1074_v12 = vadd.s32 127, %v1073_v9  ;;  %v1226_v56 = vshll.u32 %v1940_v6, %v1217_v23  ;;  %v1229_v25 = vshll.u32 %v1941_v7, %v1217_v23  ;;  %v2831_v26 = vshrl.u32 %v1161_v52, 30 }
  0xbf   :  { %v1072_v53 = vor.u32 %v1071_v33, %v1070_v44  ;;  %v1221_v22 = vshrl.u32 %v1939_v0, %v1218_v63  ;;  %v1224_v47 = vshrl.u32 %v1940_v6, %v1218_v63  ;;  %v1227_v54 = vshrl.u32 %v1941_v7, %v1218_v63 }
  0xc0   :  { %v1075_v57 = vshll.u32 %v1074_v12, 23  ;;  %v1230_v16 = vshrl.u32 %v1942_v11, %v1218_v63  ;;  %v1163_v28 = vshll.u32 %v2831_v26, 30  ;;  %v1219_v51 = vshrl.u32 %v1938_v62, %v1218_v63 }
  0xc1   :  { %v1079_v55 = vcvt.s32.f32 %v1072_v53  ;;  %v1222_v31 = vor.u32 %v1221_v22, %v1220_v10  ;;  %v1225_v15 = vor.u32 %v1224_v47, %v1223_v41  ;;  %v1228_v38 = vor.u32 %v1227_v54, %v1226_v56 }
  0xc2   :  { %v1076_v17 = vor.u32 4788187, %v1075_v57  ;;  %v1231_v24 = vor.u32 %v1230_v16, %v1229_v25  ;;  %v1232_v43 = vshll.u32 %v1942_v11, %v1217_v23  ;;  %v1164_v0 = vsub.s32 %v1160_v5, %v1163_v28 }
  0xc3   :  { %v1233_v6 = vshrl.u32 %v1943_v20, %v1218_v63  ;;  %vm1235_vm5 = vcmp.lt.s32.totalorder %v1216_v50, 1  ;;  %vm1238_vm7 = vcmp.lt.s32.totalorder %v1216_v50, 4  ;;  %vm1237_vm6 = vcmp.lt.s32.totalorder %v1216_v50, 3 }
  0xc4   :  { %v1077_v36 = vand.u32 2147483647, %v1076_v17  ;;  %v1240_v7 = vsel %vm1238_vm7, %v1228_v38, 2102212464  ;;  %v1251_v9 = vshll.u32 %v1211_v32, 8  ;;  %v1166_v39 = vsub.s32 0, %v1164_v0 }
  0xc5   :  { %v1234_v33 = vor.u32 %v1233_v6, %v1232_v43  ;;  %v1239_v62 = vsel %vm1235_vm5, %v1219_v51, %v1222_v31  ;;  %v1241_v12 = vsel %vm1237_vm6, %v1225_v15, %v1240_v7  ;;  %vm1236_vm8 = vcmp.lt.s32.totalorder %v1216_v50, 2 }
  0xc6   :  { %v1080_v44 = vmul.f32 %v1079_v55, %v1077_v36  ;;  %v1243_v11 = vsel %vm1235_vm5, %v1222_v31, %v1225_v15  ;;  %v1244_v5 = vsel %vm1238_vm7, %v1231_v24, 920167782  ;;  %v1086_v20 = vsel %vm2825_vm4, 0, %v1084_v30 }
  0xc7   :  { %v1811_v23 = vmin.u32 %v1166_v39, %v1164_v0  ;;  %v1247_v63 = vsel %vm1235_vm5, %v1225_v15, %v1228_v38  ;;  %v1242_v10 = vsel %vm1236_vm8, %v1239_v62, %v1241_v12  ;;  %v1245_v41 = vsel %vm1237_vm6, %v1228_v38, %v1244_v5 }
  0xc8   :  { %v1081_v52 = vxor.u32 2147483648, %v1080_v44  ;;  %v1248_v53 = vsel %vm1238_vm7, %v1234_v33, 1326507024  ;;  %v1246_v25 = vsel %vm1236_vm8, %v1243_v11, %v1245_v41  ;;  %v1399_v28 = vadd.s32 3, %v1086_v20 }
  0xc9   :  { %v1168_v56 = vclz %v1811_v23  ;;  %v1249_v22 = vsel %vm1237_vm6, %v1231_v24, %v1248_v53  ;;  %v2857_v47 = vmul.u32.u64.low %v1251_v9, %v1246_v25  ;;  %v2858_v17 = vmul.u32.u64.high %v1251_v9, %v1246_v25, %v2857_v47 }
  0xca   :  { %v1082_v32 = vsel %vm999_vm3, %v1081_v52, %v1080_v44  ;;  %v1250_v30 = vsel %vm1236_vm8, %v1247_v63, %v1249_v22  ;;  %v1258_v31 = vmul.u32 %v1251_v9, %v1242_v10  ;;  %v1090_v24 = vand.u32 3, %v1086_v20 }
  0xcb   :  { %v1085_v57 = vsel %vm2825_vm4, %v2511_v59, %v1082_v32  ;;  %v1812_v55 = vadd.s32 4294967294, %v1168_v56  ;;  %v2861_v54 = vmul.u32.u64.low %v1251_v9, %v1250_v30  ;;  %v2862_v16 = vmul.u32.u64.high %v1251_v9, %v1250_v30, %v2861_v54  ;;  %v1919_v56 = vld [vmem:[%s3036_s5 + $0x30] sm:$0xff] }
  0xcc   :  { %1899 = vcosq.f32 %v1085_v57  ;;  %v1261_v50 = vadd.s32 1, %v2858_v17  ;;  %v1400_v43 = vand.u32 3, %v1399_v28  ;;  %v985_v48 = vmul.f32 %v1917_v21, %v2418_v37 }
  0xcd   :  { %1901 = vsinq.f32 %v1085_v57  ;;  %vm1813_vm9 = vcmp.lt.s32.totalorder %v1812_v55, 0  ;;  %vm1260_vm11 = vc.u32 %v2862_v16, %v2857_v47  ;;  %vm1092_vm15 = vcmp.eq.s32.totalorder %v1090_v24, 0 }
  0xce   :  { %v1171_v51 = vsel %vm1813_vm9, 0, %v1812_v55  ;;  %v1262_v7 = vsel %vm1260_vm11, %v1261_v50, %v2858_v17  ;;  %vm1095_vm10 = vcmp.eq.s32.totalorder %v1090_v24, 2  ;;  %vm1405_vm0 = vcmp.eq.s32.totalorder %v1400_v43, 2 }
  0xcf   :  { %v1172_v15 = vsub.s32 32, %v1171_v51  ;;  %v1173_v36 = vshll.u32 %v1164_v0, %v1171_v51  ;;  %v1176_v38 = vsub.s32 4294967266, %v1171_v51  ;;  %v1263_v9 = vadd.s32 %v1262_v7, %v1258_v31  ;;  %v1918_v0 = vld [vmem:[%s3036_s5 + $0x18] sm:$0xff] }
  0xd0   :  { %v988_v39 = vmul.f32 %v1918_v0, %v2418_v37  ;;  %vm1402_vm1 = vcmp.eq.s32.totalorder %v1400_v43, 0  ;;  %vm1091_vm2 = vcmp.lt.s32.totalorder %v1090_v24, 2  ;;  %vm1401_vm12 = vcmp.lt.s32.totalorder %v1400_v43, 2 }
  0xd1   :  { %v1174_v6 = vshrl.u32 %v1156_v46, %v1172_v15  ;;  %v1177_v44 = vadd.s32 127, %v1176_v38  ;;  %v1264_v52 = vadd.s32 536870912, %v1263_v9  ;;  %v1186_v53 = vsub.s32 4, %v2831_v26 }
  0xd2   :  { %v991_v25 = vmul.f32 %v1919_v56, %v2418_v37  ;;  %vm1102_vm3 = vcmp.lt.s32.totalorder %v2551_v13, 0  ;;  %vm1192_vm9 = vweird.f32 %v2551_v13 }
  0xd3   :  { %v1175_v33 = vor.u32 %v1174_v6, %v1173_v36  ;;  %v1178_v62 = vshll.u32 %v1177_v44, 23  ;;  %v2879_v32 = vshrl.u32 %v1264_v52, 30  ;;  %v1187_v15 = vsel %vm1102_vm3, %v1186_v53, %v2831_v26 }
  0xd4   :  { %v1189_v7 = vsel %vm2890_vm14, 0, %v1187_v15  ;;  %v1259_v52 = vadd.s32 %v2857_v47, %v2862_v16 }
  0xd5   :  { %v1179_v20 = vor.u32 4788187, %v1178_v62  ;;  %v1182_v23 = vcvt.s32.f32 %v1175_v33  ;;  %v1266_v30 = vshll.u32 %v2879_v32, 30 }
  0xd6   :  { %v1900_v12 = vpop.eup %1899 }
  0xd7   :  { %v1902_v11 = vpop.eup %1901  ;;  %v1096_v5 = vxor.u32 2147483648, %v1900_v12  ;;  %v1180_v41 = vand.u32 2147483647, %v1179_v20  ;;  %v1267_v37 = vsub.s32 %v1263_v9, %v1266_v30 }
  0xd8   :  { %v1093_v63 = vxor.u32 2147483648, %v1902_v11 }
  0xd9   :  { %v1097_v10 = vsel %vm1095_vm10, %v1096_v5, %v1902_v11  ;;  %v1407_v57 = vsel %vm1405_vm0, %v1096_v5, %v1902_v11  ;;  %v1183_v28 = vmul.f32 %v1182_v23, %v1180_v41  ;;  %v1269_v38 = vsub.s32 0, %v1267_v37  ;;  %v1920_v41 = vld [vmem:[%s3036_s5 + $0x8] sm:$0xff] }
  0xda   :  { %v1094_v22 = vsel %vm1092_vm15, %v1900_v12, %v1093_v63  ;;  %v1404_v17 = vsel %vm1402_vm1, %v1900_v12, %v1093_v63  ;;  %v1193_v11 = vand.u32 3, %v1189_v7  ;;  %v986_v53 = vmul.f32 %v1920_v41, %v2427_v35 }
  0xdb   :  { %v1098_v55 = vsel %vm1091_vm2, %v1094_v22, %v1097_v10  ;;  %v1408_v46 = vsel %vm1401_vm12, %v1404_v17, %v1407_v57  ;;  %v1184_v50 = vxor.u32 2147483648, %v1183_v28  ;;  %v1815_v21 = vmin.u32 %v1269_v38, %v1267_v37  ;;  %v1921_v57 = vld [vmem:[%s3036_s5 + $0x20] sm:$0xff]  ;;  %v1922_v22 = vld [vmem:[%s3036_s5 + $0x38] sm:$0xff] }
  0xdc   :  { %v2896_v51 = vsel %vm1089_vm13, nan, %v1098_v55  ;;  %v1409_v31 = vsel %vm1089_vm13, nan, %v1408_v46  ;;  %v989_v47 = vmul.f32 %v1921_v57, %v2427_v35  ;;  %v992_v30 = vmul.f32 %v1922_v22, %v2427_v35 }
  0xdd   :  { %v2902_v36 = vmul.f32 %v1409_v31, %v985_v48  ;;  %v2904_v2 = vmul.f32 %v1409_v31, %v988_v39  ;;  %v2906_v24 = vmul.f32 %v1409_v31, %v991_v25  ;;  %v1185_v43 = vsel %vm1102_vm3, %v1184_v50, %v1183_v28 }
  0xde   :  { %v1627_v6 = vmul.f32 %v2896_v51, %v2896_v51  ;;  %v1188_v26 = vsel %vm2890_vm14, %v2551_v13, %v1185_v43  ;;  %v1271_v9 = vclz %v1815_v21  ;;  %v1503_v39 = vadd.s32 3, %v1189_v7 }
  0xdf   :  { %v1630_v44 = vmul.f32 %v2902_v36, %v2902_v36  ;;  %v1636_v59 = vmul.f32 %v2904_v2, %v2904_v2  ;;  %1903 = vcosq.f32 %v1188_v26  ;;  %v1642_v0 = vmul.f32 %v2906_v24, %v2906_v24 }
  0xe0   :  { %1905 = vsinq.f32 %v1188_v26  ;;  %v1816_v62 = vadd.s32 4294967294, %v1271_v9  ;;  %v1504_v20 = vand.u32 3, %v1503_v39  ;;  %vm1195_vm5 = vcmp.eq.s32.totalorder %v1193_v11, 0 }
  0xe1   :  { %v1633_v48 = vadd.f32 %v1630_v44, %v1627_v6  ;;  %vm1198_vm7 = vcmp.eq.s32.totalorder %v1193_v11, 2  ;;  %vm1194_vm11 = vcmp.lt.s32.totalorder %v1193_v11, 2  ;;  %v1289_v44 = vsub.s32 4, %v2879_v32 }
  0xe2   :  { %vm1817_vm4 = vcmp.lt.s32.totalorder %v1816_v62, 0  ;;  %vm1509_vm6 = vcmp.eq.s32.totalorder %v1504_v20, 2  ;;  %vm1506_vm8 = vcmp.eq.s32.totalorder %v1504_v20, 0  ;;  %vm1505_vm13 = vcmp.lt.s32.totalorder %v1504_v20, 2 }
  0xe3   :  { %v1639_v33 = vadd.f32 %v1636_v59, %v1633_v48  ;;  %v1274_v5 = vsel %vm1817_vm4, 0, %v1816_v62  ;;  %vm2944_vm15 = vcmp.le.f32.partialorder %v1203_v18, 0.7853982  ;;  %vm1205_vm10 = vcmp.lt.s32.totalorder %v2715_v14, 0 }
  0xe4   :  { %v1275_v23 = vsub.s32 32, %v1274_v5  ;;  %v1276_v63 = vshll.u32 %v1267_v37, %v1274_v5  ;;  %v1279_v10 = vsub.s32 4294967266, %v1274_v5  ;;  %v1290_v5 = vsel %vm1205_vm10, %v1289_v44, %v2879_v32 }
  0xe5   :  { %v1645_v12 = vadd.f32 %v1642_v0, %v1639_v33  ;;  %v1292_v32 = vsel %vm2944_vm15, 0, %v1290_v5  ;;  %vm1295_vm4 = vweird.f32 %v2715_v14 }
  0xe6   :  { %v1277_v16 = vshrl.u32 %v1259_v52, %v1275_v23  ;;  %v1280_v56 = vadd.s32 127, %v1279_v10 }
  0xe7   :  { %1907 = vrsqrt.f32 %v1645_v12 }
  0xe8   :  { %v1278_v54 = vor.u32 %v1277_v16, %v1276_v63  ;;  %v1281_v28 = vshll.u32 %v1280_v56, 23  ;;  %v1296_v56 = vand.u32 3, %v1292_v32 }
  0xe9   :  { %v1904_v25 = vpop.eup %1903 }
  0xea   :  { %v1906_v17 = vpop.eup %1905  ;;  %v1199_v55 = vxor.u32 2147483648, %v1904_v25  ;;  %v1282_v31 = vor.u32 4788187, %v1281_v28  ;;  %v1285_v50 = vcvt.s32.f32 %v1278_v54  ;;  %vm1301_vm0 = vcmp.eq.s32.totalorder %v1296_v56, 2  ;;  %v1924_v54 = vld [vmem:[%s3036_s5 + $0x28] sm:$0xff] }
  0xeb   :  { %v1196_v46 = vxor.u32 2147483648, %v1906_v17  ;;  %vm1298_vm2 = vcmp.eq.s32.totalorder %v1296_v56, 0  ;;  %v990_v28 = vmul.f32 %v1924_v54, %v2481_v1  ;;  %vm1297_vm14 = vcmp.lt.s32.totalorder %v1296_v56, 2 }
  0xec   :  { %v1200_v37 = vsel %vm1198_vm7, %v1199_v55, %v1906_v17  ;;  %v1511_v15 = vsel %vm1509_vm6, %v1199_v55, %v1906_v17  ;;  %v1283_v6 = vand.u32 2147483647, %v1282_v31  ;;  %v1923_v17 = vld [vmem:[%s3036_s5 + $0x10] sm:$0xff] }
  0xed   :  { %v1197_v38 = vsel %vm1195_vm5, %v1904_v25, %v1196_v46  ;;  %v1508_v35 = vsel %vm1506_vm8, %v1904_v25, %v1196_v46  ;;  %vm3056_vm5 = vcmask 130048   ;;  %vm3059_vm8 = vcmask 123904  }
  0xee   :  { %v1201_v43 = vsel %vm1194_vm11, %v1197_v38, %v1200_v37  ;;  %v1512_v59 = vsel %vm1505_vm13, %v1508_v35, %v1511_v15  ;;  %v1286_v9 = vmul.f32 %v1285_v50, %v1283_v6  ;;  %v1925_v37 = vld [vmem:[%s3036_s5 + $0x40] sm:$0xff]  ;;  %v915_v35 = vmul.f32 %v2720_v34, %v2619_v60  ;;  %vm3057_vm7 = vmmov %vm3056_vm5 }
  0xef   :  { %v2940_v7 = vsel %vm1192_vm9, nan, %v1201_v43  ;;  %v1513_v48 = vsel %vm1192_vm9, nan, %v1512_v59  ;;  %v993_v31 = vmul.f32 %v1925_v37, %v2481_v1  ;;  %vm3058_vm6 = vmmov %vm3056_vm5  ;;  %vm3061_vm11 = vcmask 122880  }
  0xf0   :  { %v1619_v0 = vmul.f32 %v1513_v48, %v986_v53  ;;  %v1622_v39 = vmul.f32 %v1513_v48, %v989_v47  ;;  %v1625_v33 = vmul.f32 %v1513_v48, %v992_v30  ;;  %v1628_v62 = vmul.f32 %v2940_v7, %v2940_v7  ;;  %vm3060_vm9 = vmmov %vm3056_vm5 }
  0xf1   :  { %v1908_v26 = vpop.eup %1907  ;;  %v1287_v11 = vxor.u32 2147483648, %v1286_v9  ;;  %vm3062_vm13 = vmmov %vm3061_vm11 }
  0xf2   :  { %v1651_v12 = vmul.f32 %v1908_v26, %v2896_v51  ;;  %v1654_v52 = vmul.f32 %v1908_v26, %v2902_v36  ;;  %v1657_v18 = vmul.f32 %v1908_v26, %v2904_v2  ;;  %v1631_v13 = vmul.f32 %v1619_v0, %v1619_v0 }
  0xf3   :  { %v1637_v20 = vmul.f32 %v1622_v39, %v1622_v39  ;;  %v1660_v23 = vmul.f32 %v1908_v26, %v2906_v24  ;;  %v1288_v51 = vsel %vm1205_vm10, %v1287_v11, %v1286_v9  ;;  %v1643_v2 = vmul.f32 %v1625_v33, %v1625_v33 }
  0xf4   :  { %v1663_v63 = vmul.f32 %v1651_v12, %v2690_v4  ;;  %v1666_v10 = vmul.f32 %v1654_v52, %v2693_v8  ;;  %v1672_v41 = vmul.f32 %v1657_v18, %v2696_v42  ;;  %v1634_v36 = vadd.f32 %v1631_v13, %v1628_v62 }
  0xf5   :  { %v1291_v53 = vsel %vm2944_vm15, %v2715_v14, %v1288_v51  ;;  %v1678_v24 = vmul.f32 %v1660_v23, %v2699_v40  ;;  %v1607_v42 = vadd.s32 3, %v1292_v32  ;;  %v987_v40 = vmul.f32 %v1923_v17, %v2481_v1  ;;  %v1713_v51 = vld [vmem:[%s3037_s6 + $0x31] sm:$0xff] }
  0xf6   :  { %v1669_v57 = vadd.f32 %v1666_v10, %v1663_v63  ;;  %1909 = vcosq.f32 %v1291_v53  ;;  %v1640_v4 = vadd.f32 %v1637_v20, %v1634_v36 }
  0xf7   :  { %1911 = vsinq.f32 %v1291_v53  ;;  %v1608_v25 = vand.u32 3, %v1607_v42  ;;  %v916_v42 = vmul.f32 %v2799_v29, %v2733_v19 }
  0xf8   :  { %v1675_v8 = vadd.f32 %v1672_v41, %v1669_v57  ;;  %v1646_v47 = vadd.f32 %v1643_v2, %v1640_v4  ;;  %v1716_v2 = vld [vmem:[%s3037_s6 + $0x43] sm:$0x3] }
  0xf9   :  { %vm1613_vm1 = vcmp.eq.s32.totalorder %v1608_v25, 2  ;;  %vm1610_vm12 = vcmp.eq.s32.totalorder %v1608_v25, 0  ;;  %vm1609_vm3 = vcmp.lt.s32.totalorder %v1608_v25, 2 }
  0xfa   :  { %v1681_v16 = vadd.f32 %v1678_v24, %v1675_v8  ;;  %1913 = vrsqrt.f32 %v1646_v47 }
  0xfc   :  { %v1684_v10 = vmul.f32 %v1681_v16, %v1681_v16 }
 0x100   :  { %v1910_v22 = vpop.eup %1909 }
 0x101   :  { %v1912_v30 = vpop.eup %1911  ;;  %v1302_v55 = vxor.u32 2147483648, %v1910_v22 }
 0x102   :  { %v1299_v46 = vxor.u32 2147483648, %v1912_v30 }
 0x103   :  { %v1303_v50 = vsel %vm1301_vm0, %v1302_v55, %v1912_v30  ;;  %v1615_v15 = vsel %vm1613_vm1, %v1302_v55, %v1912_v30 }
 0x104   :  { %v1914_v38 = vpop.eup %1913  ;;  %v1300_v43 = vsel %vm1298_vm2, %v1910_v22, %v1299_v46  ;;  %v1612_v6 = vsel %vm1610_vm12, %v1910_v22, %v1299_v46 }
 0x105   :  { %v1304_v44 = vsel %vm1297_vm14, %v1300_v43, %v1303_v50  ;;  %v1616_v59 = vsel %vm1609_vm3, %v1612_v6, %v1615_v15  ;;  %v1652_v26 = vmul.f32 %v1914_v38, %v2940_v7  ;;  %v1655_v21 = vmul.f32 %v1914_v38, %v1619_v0 }
 0x106   :  { %v1305_v48 = vsel %vm1295_vm4, nan, %v1304_v44  ;;  %v1617_v9 = vsel %vm1295_vm4, nan, %v1616_v59  ;;  %v1658_v1 = vmul.f32 %v1914_v38, %v1622_v39  ;;  %v1661_v62 = vmul.f32 %v1914_v38, %v1625_v33 }
 0x107   :  { %v1620_v14 = vmul.f32 %v1617_v9, %v987_v40  ;;  %v1623_v12 = vmul.f32 %v1617_v9, %v990_v28  ;;  %v1626_v52 = vmul.f32 %v1617_v9, %v993_v31  ;;  %v1629_v18 = vmul.f32 %v1305_v48, %v1305_v48 }
 0x108   :  { %v1664_v11 = vmul.f32 %v1652_v26, %v915_v35  ;;  %v1667_v5 = vmul.f32 %v1655_v21, %v2728_v27  ;;  %v1673_v60 = vmul.f32 %v1658_v1, %v2739_v49  ;;  %v1679_v34 = vmul.f32 %v1661_v62, %v2743_v58  ;;  %v1714_v49 = vld [vmem:[%s3037_s6 + $0x39] sm:$0x3]  ;;  %v1715_v58 = vld [vmem:[%s3037_s6 + $0x3b] sm:$0xff]  ;;  %v188_v1 = vld [vmem:[%s3037_s6 + $0x46] sm:$0x1] }
 0x109   :  { %v1632_v13 = vmul.f32 %v1620_v14, %v1620_v14  ;;  %v1638_v20 = vmul.f32 %v1623_v12, %v1623_v12  ;;  %v1644_v0 = vmul.f32 %v1626_v52, %v1626_v52  ;;  %v1687_v27 = vsel %vm3056_vm5, %v1684_v10, 0.0 }
 0x10a   :  { %v1670_v23 = vadd.f32 %v1667_v5, %v1664_v11  ;;  %v1717_v57 = vsub.f32 %v1713_v51, %v1715_v58  ;;  %v1718_v24 = vsub.f32 %v1714_v49, %v1716_v2  ;;  %v122_v11 = vpop.xlane.xlu0 %121 }
 0x10b   :  { %v1635_v7 = vadd.f32 %v1632_v13, %v1629_v18  ;;  %v123_v5 = vrot.slane %v122_v11, 4 }
 0x10c   :  { %v1676_v63 = vadd.f32 %v1673_v60, %v1670_v23  ;;  %v1719_v4 = vmul.f32 %v1717_v57, %v1717_v57  ;;  %v1720_v8 = vmul.f32 %v1718_v24, %v1718_v24 }
 0x10d   :  { %v1641_v39 = vadd.f32 %v1638_v20, %v1635_v7 }
 0x10e   :  { %v1682_v33 = vadd.f32 %v1679_v34, %v1676_v63  ;;  %v1721_v16 = vsel %vm3058_vm6, %v1719_v4, 0.0  ;;  %v1722_v56 = vsel %vm3059_vm8, %v1720_v8, 0.0  ;;  %v178_v60 = vpop.xlane.xlu0 %177  ;;  %v124_v34 = vadd.f32 %v123_v5, %v122_v11 }
 0x10f   :  { %v1647_v41 = vadd.f32 %v1644_v0, %v1641_v39  ;;  %v1723_v46 = vadd.f32 %v1722_v56, %v1721_v16  ;;  %v179_v20 = vrot.slane %v178_v60, 4 }
 0x110   :  { %v1685_v36 = vmul.f32 %v1682_v33, %v1682_v33  ;;  %v125_v13 = vrot.slane %v124_v34, 2 }
 0x111   :  { %1915 = vrsqrt.f32 %v1647_v41  ;;  %v1724_v19 = vrot.slane %v1723_v46, 4  ;;  %v180_v7 = vadd.f32 %v179_v20, %v178_v60 }
 0x112   :  { %v1688_v53 = vsel %vm3057_vm7, %v1685_v36, 0.0  ;;  %v126_v23 = vadd.f32 %v125_v13, %v124_v34 }
 0x113   :  { %v1689_v32 = vadd.f32 %v1688_v53, %v1687_v27  ;;  %v1725_v15 = vadd.f32 %v1724_v19, %v1723_v46  ;;  %v181_v63 = vrot.slane %v180_v7, 2 }
 0x114   :  { %v127_v0 = vrot.slane %v126_v23, 1 }
 0x115   :  { %v1726_v6 = vrot.slane %v1725_v15, 2  ;;  %v182_v39 = vadd.f32 %v181_v63, %v180_v7 }
 0x116   :  { %v128_v10 = vadd.f32 %v127_v0, %v126_v23 }
 0x117   :  { %v1727_v26 = vadd.f32 %v1726_v6, %v1725_v15  ;;  %v183_v33 = vrot.slane %v182_v39, 1 }
 0x118   :  { %1830 = vpush %v128_v10 }
 0x119   :  { %v184_v41 = vadd.f32 %v183_v33, %v182_v39 }
 0x11b   :  { %v1916_v47 = vpop.eup %1915  ;;  %1832 = vpush %v184_v41 }
 0x11c   :  { %v1653_v25 = vmul.f32 %v1916_v47, %v1305_v48  ;;  %v1656_v22 = vmul.f32 %v1916_v47, %v1620_v14  ;;  %v1659_v30 = vmul.f32 %v1916_v47, %v1623_v12  ;;  %v1662_v17 = vmul.f32 %v1916_v47, %v1626_v52 }
 0x11e   :  { %v1665_v40 = vmul.f32 %v1653_v25, %v916_v42  ;;  %v1668_v55 = vmul.f32 %v1656_v22, %v2806_v3  ;;  %v1674_v54 = vmul.f32 %v1659_v30, %v2810_v61  ;;  %v1680_v28 = vmul.f32 %v1662_v17, %v2814_v45 }
 0x11f   :  { %v1728_v61 = vrot.slane %v1727_v26, 1 }
 0x120   :  { %v1671_v37 = vadd.f32 %v1668_v55, %v1665_v40 }
 0x121   :  { %v1729_v9 = vadd.f32 %v1728_v61, %v1727_v26 }
 0x122   :  { %v1677_v31 = vadd.f32 %v1674_v54, %v1671_v37 }
 0x123   :  { %v1730_v12 = vmul.f32 %v1729_v9, %v188_v1 }
 0x124   :  { %v1683_v29 = vadd.f32 %v1680_v28, %v1677_v31 }
 0x125   :  { %v1731_v18 = vsel %vm3062_vm13, %v1730_v12, 0.0 }
 0x126   :  { %v1686_v50 = vmul.f32 %v1683_v29, %v1683_v29 }
 0x128   :  { %v1690_v38 = vsel %vm3060_vm9, %v1686_v50, 0.0 }
 0x129   :  { %v1691_v35 = vadd.f32 %v1690_v38, %v1689_v32 }
 0x12b   :  { %v1692_v43 = vrot.slane %v1691_v35, 4 }
 0x12d   :  { %v1693_v44 = vadd.f32 %v1692_v43, %v1691_v35 }
 0x12f   :  { %v1694_v59 = vrot.slane %v1693_v44, 2 }
 0x131   :  { %v1695_v3 = vadd.f32 %v1694_v59, %v1693_v44 }
 0x133   :  { %v1696_v21 = vrot.slane %v1695_v3, 1 }
 0x135   :  { %v1697_v48 = vadd.f32 %v1696_v21, %v1695_v3 }
 0x137   :  { %v1698_v45 = vsub.f32 24.0, %v1697_v48 }
 0x139   :  { %v1699_v62 = vmul.f32 8.0, %v1698_v45 }
 0x13b   :  { %v1700_v14 = vmul.f32 %v1699_v62, %v188_v1 }
 0x13d   :  { %v1701_v52 = vsel %vm3061_vm11, %v1700_v14, 0.0 }
 0x13e   :  { %1702 = vadd.xlane.f32.xlu1 %v1701_v52 }
 0x142   :  { %1732 = vadd.xlane.f32.xlu1 %v1731_v18 }
 0x149   :  { %s1831_s6 = spop %1830 }
 0x14a   :  { %131 = sst [smem:[#allocation2]] %s1831_s6 }
 0x14c   :  { %s1833_s28 = spop %1832 }
 0x14d   :  { %187 = sst [smem:[#allocation2 + $0x1]] %s1833_s28 }
 0x1cb   :  { %v1703_v51 = vpop.xlane.xlu1 %1702 }
 0x1cc   :  { %v1704_v36 = vrot.slane %v1703_v51, 4 }
 0x1ce   :  { %v1705_v27 = vadd.f32 %v1704_v36, %v1703_v51 }
 0x1cf   :  { %v1733_v49 = vpop.xlane.xlu1 %1732 }
 0x1d0   :  { %v1706_v58 = vrot.slane %v1705_v27, 2  ;;  %v1734_v2 = vrot.slane %v1733_v49, 4 }
 0x1d2   :  { %v1707_v53 = vadd.f32 %v1706_v58, %v1705_v27  ;;  %v1735_v32 = vadd.f32 %v1734_v2, %v1733_v49 }
 0x1d4   :  { %v1708_v57 = vrot.slane %v1707_v53, 1  ;;  %v1736_v24 = vrot.slane %v1735_v32, 2 }
 0x1d6   :  { %v1709_v4 = vadd.f32 %v1708_v57, %v1707_v53  ;;  %v1737_v8 = vadd.f32 %v1736_v24, %v1735_v32 }
 0x1d8   :  { %1858 = vpush %v1709_v4  ;;  %v1738_v42 = vrot.slane %v1737_v8, 1 }
 0x1da   :  { %v1739_v47 = vadd.f32 %v1738_v42, %v1737_v8 }
 0x1dc   :  { %1860 = vpush %v1739_v47 }
 0x209   :  { %s1859_s29 = spop %1858 }
 0x20a   :  { %1712 = sst [smem:[#allocation2 + $0x2]] %s1859_s29 }
 0x20d   :  { %s1861_s30 = spop %1860 }
 0x20e   :  { %1742 = sst [smem:[#allocation2 + $0x3]] %s1861_s30 }
 0x20f   :  { %1935 = shalt.err (!%p1932_p2)
}
 0x210   :  { %s1944_s14 = smov [#allocation2]  }
 0x211   :  { %1750 = dma.smem_to_hbm %s1944_s14, 16, %s3038_s7, [#allocation3]  }
 0x212   :  { %1936 = dma.done.wait [#allocation3], 16  }
 0x213   :  { %1937 = vsyncadd [#allocation3], 4294967280 }
 0x214   :  { %1754 = sfence }
 0x215   :  { %1755 = vsyncpa [#allocation3], 1 }

</bundles_post_ra>
